<compile_context>
chip_gen: v7x
topology: tpu7x:2x2x1
jax: 0.10.0
libtpu: 0.0.40
codegen_flags: <defaults>
</compile_context>

<pallas_src>
import jax
import jax.numpy as jnp
from jax.experimental import pallas as pl
from jax.experimental.pallas import tpu as pltpu

LANE = 128
SUBLANE = 8
SEQ_CHUNK = 8  # chunk of the sequence axis processed per vectorized histogram step


def _round_up(x: int, m: int) -> int:
    return ((x + m - 1) // m) * m


def _vmem_capacity_bytes() -> int:
    """Physical VMEM of the current chip; conservative fallback if unknown."""
    try:
        info = pltpu.get_tpu_info()
        cap = getattr(info, "vmem_capacity_bytes", None)
        if cap:
            return int(cap)
    except Exception:
        pass
    return 64 << 20  # v7x-sized fallback (safe lower bound)


def dan_kernel(ids_ref, m1_ref, b1_ref, w2_ref, b2_ref, w3_ref, b3_ref, out_ref):
    """One batch tile: fused (embedding-gather + mean + fc1) + fc2 + fc3 head."""
    ids = ids_ref[...]                         # (tile_b, S) int32
    tile_b, seq = ids.shape
    vocab_p = m1_ref.shape[0]

    # Histogram: counts[b, v] = #{s : ids[b, s] == v}.  Vectorized per chunk so
    # the reduction runs on the XLU instead of a seq-long serial VPU add chain,
    # and the 3-D intermediate stays at (tile_b, SEQ_CHUNK, vocab_p).
    counts = jnp.zeros((tile_b, vocab_p), jnp.float32)
    for s0 in range(0, seq, SEQ_CHUNK):
        s1 = min(s0 + SEQ_CHUNK, seq)
        tok = ids[:, s0:s1]                    # (tile_b, c), static slice
        iota_v = jax.lax.broadcasted_iota(jnp.int32, (tile_b, s1 - s0, vocab_p), 2)
        onehot = (tok[:, :, None] == iota_v).astype(jnp.float32)
        counts = counts + onehot.sum(axis=1)   # sublane reduction per chunk

    inv_s = jnp.float32(1.0 / seq)

    # Folded first layer: h1 = relu((counts @ (table @ W1)) / S + b1)
    h1 = jnp.dot(counts, m1_ref[...], preferred_element_type=jnp.float32) * inv_s
    h1 = jnp.maximum(h1 + b1_ref[...], 0.0)
    h2 = jnp.dot(h1, w2_ref[...], preferred_element_type=jnp.float32) + b2_ref[...]
    h2 = jnp.maximum(h2, 0.0)
    h3 = jnp.dot(h2, w3_ref[...], preferred_element_type=jnp.float32) + b3_ref[...]
    out_ref[...] = jax.nn.sigmoid(h3)          # lane-dense (tile_b, Op) store


def nn3dan_forward(token_ids, embedding_table, w1, b1, w2, b2, w3, b3,
                   *, tile_b=128):
    """token_ids: (B, S) ints. Linear weights stored as (in, out) = PyTorch W.T.

    Returns (B, 2) float32 = sigmoid(relu(relu(mean_emb @ W1 + b1) @ W2 + b2) @ W3 + b3).
    """
    B, S = token_ids.shape
    V, E = embedding_table.shape
    H = w1.shape[1]
    O = w3.shape[1]

    Vp = _round_up(V, LANE)
    Hp = _round_up(H, LANE)
    Op = _round_up(O, LANE)

    # Batch tile: multiple of the sublane width, no larger than the batch, and
    # clamped so the "parallel" batch grid has at least 2 steps when possible
    # (keeps both TensorCores busy on v7x; harmless on single-TC v5e/v6e).
    b_ceil = _round_up(max(B, 1), SUBLANE)
    tile_b = max(SUBLANE, _round_up(min(tile_b, b_ceil), SUBLANE))
    if b_ceil >= 2 * SUBLANE:
        tile_b = min(tile_b, _round_up(pl.cdiv(b_ceil, 2), SUBLANE))
    Bp = _round_up(B, tile_b)
    grid = (Bp // tile_b,)

    f32 = jnp.float32
    # Fold the embedding table into fc1 (linear ops commute with the mean).
    m1 = embedding_table.astype(f32) @ w1.astype(f32)            # (V, H)
    m1_p = jnp.zeros((Vp, Hp), f32).at[:V, :H].set(m1)
    w2_p = jnp.zeros((Hp, Hp), f32).at[:H, :H].set(w2.astype(f32))
    w3_p = jnp.zeros((Hp, Op), f32).at[:H, :O].set(w3.astype(f32))
    b1_p = jnp.zeros((1, Hp), f32).at[:, :H].set(b1.reshape(1, H).astype(f32))
    b2_p = jnp.zeros((1, Hp), f32).at[:, :H].set(b2.reshape(1, H).astype(f32))
    b3_p = jnp.zeros((1, Op), f32).at[:, :O].set(b3.reshape(1, O).astype(f32))
    ids_p = jnp.zeros((Bp, S), jnp.int32).at[:B, :].set(token_ids.astype(jnp.int32))

    # Chip-aware VMEM budget:
    #   resident (single-buffered) weights + double-buffered ids/out streams +
    #   in-kernel intermediates (counts, per-chunk one-hot, h1/h2/h3) + headroom,
    #   capped at ~80% of physical VMEM (leaves compiler scratch headroom).
    chunk = min(S, SEQ_CHUNK)
    resident_bytes = 4 * (Vp * Hp + Hp * Hp + Hp * Op + 2 * Hp + Op)
    stream_bytes = 2 * (4 * tile_b * S + 4 * tile_b * Op)
    interm_bytes = 4 * tile_b * (Vp + chunk * Vp + 2 * Hp + 2 * Op)
    want = resident_bytes + stream_bytes + interm_bytes + (4 << 20)
    vmem_cap = _vmem_capacity_bytes()
    vmem_limit = int(min(max(want, 8 << 20), int(0.8 * vmem_cap)))

    const = lambda i: (0, 0)

    def build_and_run(single_buffer_weights: bool):
        if single_buffer_weights and hasattr(pl, "Buffered"):
            resident = lambda shape: pl.BlockSpec(shape, const,
                                                  pipeline_mode=pl.Buffered(1))
        else:
            resident = lambda shape: pl.BlockSpec(shape, const)
        return pl.pallas_call(
            dan_kernel,
            out_shape=jax.ShapeDtypeStruct((Bp, Op), jnp.float32),
            grid=grid,
            in_specs=[
                pl.BlockSpec((tile_b, S), lambda i: (i, 0)),  # token ids (tiled, dbl-buf)
                resident((Vp, Hp)),                           # M1 = table @ W1 (resident)
                resident((1, Hp)),                            # b1
                resident((Hp, Hp)),                           # W2
                resident((1, Hp)),                            # b2
                resident((Hp, Op)),                           # W3
                resident((1, Op)),                            # b3
            ],
            out_specs=pl.BlockSpec((tile_b, Op), lambda i: (i, 0)),
            compiler_params=pltpu.CompilerParams(
                dimension_semantics=("parallel",),
                vmem_limit_bytes=vmem_limit,
            ),
        )(ids_p, m1_p, b1_p, w2_p, b2_p, w3_p, b3_p)

    try:
        out_p = build_and_run(True)
    except Exception:
        # Fallback: default double-buffering everywhere (always supported).
        out_p = build_and_run(False)

    # Padded output lanes hold sigmoid(0) = 0.5 and padded batch rows are
    # garbage; always slice before any consumer.
    return out_p[:B, :O]


def reference_forward(token_ids, embedding_table, w1, b1, w2, b2, w3, b3):
    """Pure-JAX reference mirroring the PyTorch forward."""
    embedded = embedding_table[token_ids]
    avg = jnp.mean(embedded, axis=1)
    h1 = jax.nn.relu(avg @ w1 + b1)
    h2 = jax.nn.relu(h1 @ w2 + b2)
    return jax.nn.sigmoid(h2 @ w3 + b3)


if __name__ == "__main__":
    # Small, module-consistent shapes.
    vocab_size, embedding_dim, hidden_size = 100, 32, 32
    batch, seq = 16, 8

    key = jax.random.PRNGKey(0)
    k_ids, k_emb, k_w1, k_b1, k_w2, k_b2, k_w3, k_b3 = jax.random.split(key, 8)

    # Linear weights stored as (in_features, out_features), i.e. W.T of PyTorch.
    embedding_table = jax.random.normal(k_emb, (vocab_size, embedding_dim), jnp.float32) * 0.1
    w1 = jax.random.normal(k_w1, (embedding_dim, hidden_size), jnp.float32) * 0.1
    b1 = jax.random.normal(k_b1, (hidden_size,), jnp.float32) * 0.1
    w2 = jax.random.normal(k_w2, (hidden_size, hidden_size), jnp.float32) * 0.1
    b2 = jax.random.normal(k_b2, (hidden_size,), jnp.float32) * 0.1
    w3 = jax.random.normal(k_w3, (hidden_size, 2), jnp.float32) * 0.1
    b3 = jax.random.normal(k_b3, (2,), jnp.float32) * 0.1

    token_ids = jax.random.randint(k_ids, (batch, seq), 0, vocab_size, dtype=jnp.int32)

    # tile_b clamps to 8 here (grid=(2,)), exercising the multi-step batch pipeline.
    out = nn3dan_forward(token_ids, embedding_table, w1, b1, w2, b2, w3, b3)
    out = jax.block_until_ready(out)

    ref = reference_forward(token_ids, embedding_table, w1, b1, w2, b2, w3, b3)
    assert out.shape == (batch, 2), out.shape
    assert jnp.allclose(out, ref, atol=1e-5, rtol=1e-5), "mismatch vs JAX reference"

    print("KERNEL_OK")
</pallas_src>

<mosaic_0001>
module attributes {stable_mosaic.version = 11 : i64} {
  func.func @dan_kernel(%arg0: i32, %arg1: memref<8x8xi32, #tpu.memory_space<vmem>>, %arg2: memref<128x128xf32, #tpu.memory_space<vmem>>, %arg3: memref<1x128xf32, #tpu.memory_space<vmem>>, %arg4: memref<128x128xf32, #tpu.memory_space<vmem>>, %arg5: memref<1x128xf32, #tpu.memory_space<vmem>>, %arg6: memref<128x128xf32, #tpu.memory_space<vmem>>, %arg7: memref<1x128xf32, #tpu.memory_space<vmem>>, %arg8: memref<8x128xf32, #tpu.memory_space<vmem>>) attributes {dimension_semantics = [#tpu.dimension_semantics<parallel>], iteration_bounds = array<i64: 2>, scalar_prefetch = 0 : i64, scratch_operands = 0 : i64, tpu.core_type = #tpu.core_type<tc>, window_params = [{transform_indices = @transform_0, window_bounds = array<i64: 8, 8>}, {pipeline_mode = #tpu.pipeline_mode<synchronous>, transform_indices = @transform_1, window_bounds = array<i64: 128, 128>}, {pipeline_mode = #tpu.pipeline_mode<synchronous>, transform_indices = @transform_2, window_bounds = array<i64: 1, 128>}, {pipeline_mode = #tpu.pipeline_mode<synchronous>, transform_indices = @transform_3, window_bounds = array<i64: 128, 128>}, {pipeline_mode = #tpu.pipeline_mode<synchronous>, transform_indices = @transform_4, window_bounds = array<i64: 1, 128>}, {pipeline_mode = #tpu.pipeline_mode<synchronous>, transform_indices = @transform_5, window_bounds = array<i64: 128, 128>}, {pipeline_mode = #tpu.pipeline_mode<synchronous>, transform_indices = @transform_6, window_bounds = array<i64: 1, 128>}, {transform_indices = @transform_7, window_bounds = array<i64: 8, 128>}]} {
    %c0 = arith.constant 0 : index
    %c0_0 = arith.constant 0 : index
    %0 = vector.load %arg1[%c0, %c0_0] : memref<8x8xi32, #tpu.memory_space<vmem>>, vector<8x8xi32>
    %cst = arith.constant 0.000000e+00 : f32
    %1 = vector.broadcast %cst : f32 to vector<8x128xf32>
    %2 = tpu.iota {dimensions = array<i32: 2>} : vector<8x8x128xi32>
    %3 = vector.shape_cast %0 : vector<8x8xi32> to vector<8x8x1xi32>
    %4 = vector.broadcast %3 : vector<8x8x1xi32> to vector<8x8x128xi32>
    %5 = arith.cmpi eq, %4, %2 : vector<8x8x128xi32>
    %6 = arith.extui %5 : vector<8x8x128xi1> to vector<8x8x128xi32>
    %7 = arith.sitofp %6 : vector<8x8x128xi32> to vector<8x8x128xf32>
    %cst_1 = arith.constant dense<0.000000e+00> : vector<8x128xf32>
    %8 = vector.multi_reduction <add>, %7, %cst_1 [1] : vector<8x8x128xf32> to vector<8x128xf32>
    %9 = arith.addf %1, %8 : vector<8x128xf32>
    %c0_2 = arith.constant 0 : index
    %c0_3 = arith.constant 0 : index
    %10 = vector.load %arg2[%c0_2, %c0_3] : memref<128x128xf32, #tpu.memory_space<vmem>>, vector<128x128xf32>
    %cst_4 = arith.constant dense<0.000000e+00> : vector<8x128xf32>
    %11 = tpu.matmul %9, %10, %cst_4 {dimension_numbers = #tpu.dot_dimension_numbers<[1], [0], [0], [1], [0, 0, 1, 1], [], []>} : vector<8x128xf32>, vector<128x128xf32>, vector<8x128xf32> -> vector<8x128xf32>
    %cst_5 = arith.constant 1.250000e-01 : f32
    %12 = vector.broadcast %cst_5 : f32 to vector<8x128xf32>
    %13 = arith.mulf %11, %12 : vector<8x128xf32>
    %c0_6 = arith.constant 0 : index
    %c0_7 = arith.constant 0 : index
    %14 = vector.load %arg3[%c0_6, %c0_7] : memref<1x128xf32, #tpu.memory_space<vmem>>, vector<1x128xf32>
    %15 = vector.broadcast %14 : vector<1x128xf32> to vector<8x128xf32>
    %16 = arith.addf %13, %15 : vector<8x128xf32>
    %cst_8 = arith.constant 0.000000e+00 : f32
    %17 = vector.broadcast %cst_8 : f32 to vector<8x128xf32>
    %18 = arith.maximumf %16, %17 : vector<8x128xf32>
    %c0_9 = arith.constant 0 : index
    %c0_10 = arith.constant 0 : index
    %19 = vector.load %arg4[%c0_9, %c0_10] : memref<128x128xf32, #tpu.memory_space<vmem>>, vector<128x128xf32>
    %cst_11 = arith.constant dense<0.000000e+00> : vector<8x128xf32>
    %20 = tpu.matmul %18, %19, %cst_11 {dimension_numbers = #tpu.dot_dimension_numbers<[1], [0], [0], [1], [0, 0, 1, 1], [], []>} : vector<8x128xf32>, vector<128x128xf32>, vector<8x128xf32> -> vector<8x128xf32>
    %c0_12 = arith.constant 0 : index
    %c0_13 = arith.constant 0 : index
    %21 = vector.load %arg5[%c0_12, %c0_13] : memref<1x128xf32, #tpu.memory_space<vmem>>, vector<1x128xf32>
    %22 = vector.broadcast %21 : vector<1x128xf32> to vector<8x128xf32>
    %23 = arith.addf %20, %22 : vector<8x128xf32>
    %cst_14 = arith.constant 0.000000e+00 : f32
    %24 = vector.broadcast %cst_14 : f32 to vector<8x128xf32>
    %25 = arith.maximumf %23, %24 : vector<8x128xf32>
    %c0_15 = arith.constant 0 : index
    %c0_16 = arith.constant 0 : index
    %26 = vector.load %arg6[%c0_15, %c0_16] : memref<128x128xf32, #tpu.memory_space<vmem>>, vector<128x128xf32>
    %cst_17 = arith.constant dense<0.000000e+00> : vector<8x128xf32>
    %27 = tpu.matmul %25, %26, %cst_17 {dimension_numbers = #tpu.dot_dimension_numbers<[1], [0], [0], [1], [0, 0, 1, 1], [], []>} : vector<8x128xf32>, vector<128x128xf32>, vector<8x128xf32> -> vector<8x128xf32>
    %c0_18 = arith.constant 0 : index
    %c0_19 = arith.constant 0 : index
    %28 = vector.load %arg7[%c0_18, %c0_19] : memref<1x128xf32, #tpu.memory_space<vmem>>, vector<1x128xf32>
    %29 = vector.broadcast %28 : vector<1x128xf32> to vector<8x128xf32>
    %30 = arith.addf %27, %29 : vector<8x128xf32>
    %31 = arith.negf %30 : vector<8x128xf32>
    %32 = math.exp %31 : vector<8x128xf32>
    %cst_20 = arith.constant 1.000000e+00 : f32
    %33 = vector.broadcast %cst_20 : f32 to vector<8x128xf32>
    %34 = arith.addf %33, %32 : vector<8x128xf32>
    %35 = arith.divf %33, %34 : vector<8x128xf32>
    %c0_21 = arith.constant 0 : index
    %c0_22 = arith.constant 0 : index
    %36 = vector.load %arg8[%c0_21, %c0_22] : memref<8x128xf32, #tpu.memory_space<vmem>>, vector<8x128xf32>
    tpu.vector_store %arg8[%c0_21, %c0_22], %35 {strides = array<i32>} : memref<8x128xf32, #tpu.memory_space<vmem>>, vector<8x128xf32>,
    return
  }
  func.func @transform_0(%arg0: i32) -> (i32, i32) {
    %c0_i32 = arith.constant 0 : i32
    %c0_i32_0 = arith.constant 0 : i32
    return %arg0, %c0_i32 : i32, i32
  }
  func.func @transform_1(%arg0: i32) -> (i32, i32) {
    %c0_i32 = arith.constant 0 : i32
    %c0_i32_0 = arith.constant 0 : i32
    %c0_i32_1 = arith.constant 0 : i32
    return %c0_i32, %c0_i32_0 : i32, i32
  }
  func.func @transform_2(%arg0: i32) -> (i32, i32) {
    %c0_i32 = arith.constant 0 : i32
    %c0_i32_0 = arith.constant 0 : i32
    %c0_i32_1 = arith.constant 0 : i32
    return %c0_i32, %c0_i32_0 : i32, i32
  }
  func.func @transform_3(%arg0: i32) -> (i32, i32) {
    %c0_i32 = arith.constant 0 : i32
    %c0_i32_0 = arith.constant 0 : i32
    %c0_i32_1 = arith.constant 0 : i32
    return %c0_i32, %c0_i32_0 : i32, i32
  }
  func.func @transform_4(%arg0: i32) -> (i32, i32) {
    %c0_i32 = arith.constant 0 : i32
    %c0_i32_0 = arith.constant 0 : i32
    %c0_i32_1 = arith.constant 0 : i32
    return %c0_i32, %c0_i32_0 : i32, i32
  }
  func.func @transform_5(%arg0: i32) -> (i32, i32) {
    %c0_i32 = arith.constant 0 : i32
    %c0_i32_0 = arith.constant 0 : i32
    %c0_i32_1 = arith.constant 0 : i32
    return %c0_i32, %c0_i32_0 : i32, i32
  }
  func.func @transform_6(%arg0: i32) -> (i32, i32) {
    %c0_i32 = arith.constant 0 : i32
    %c0_i32_0 = arith.constant 0 : i32
    %c0_i32_1 = arith.constant 0 : i32
    return %c0_i32, %c0_i32_0 : i32, i32
  }
  func.func @transform_7(%arg0: i32) -> (i32, i32) {
    %c0_i32 = arith.constant 0 : i32
    %c0_i32_0 = arith.constant 0 : i32
    return %arg0, %c0_i32 : i32, i32
  }
}

module attributes {stable_mosaic.version = 11 : i64} {
  func.func @dan_kernel(%arg0: i32, %arg1: memref<8x8xi32, #tpu.memory_space<vmem>>, %arg2: memref<128x128xf32, #tpu.memory_space<vmem>>, %arg3: memref<1x128xf32, #tpu.memory_space<vmem>>, %arg4: memref<128x128xf32, #tpu.memory_space<vmem>>, %arg5: memref<1x128xf32, #tpu.memory_space<vmem>>, %arg6: memref<128x128xf32, #tpu.memory_space<vmem>>, %arg7: memref<1x128xf32, #tpu.memory_space<vmem>>, %arg8: memref<8x128xf32, #tpu.memory_space<vmem>>) attributes {dimension_semantics = [#tpu.dimension_semantics<parallel>], iteration_bounds = array<i64: 2>, scalar_prefetch = 0 : i64, scratch_operands = 0 : i64, tpu.core_type = #tpu.core_type<tc>, window_params = [{transform_indices = @transform_0, window_bounds = array<i64: 8, 8>}, {pipeline_mode = #tpu.pipeline_mode<synchronous>, transform_indices = @transform_1, window_bounds = array<i64: 128, 128>}, {pipeline_mode = #tpu.pipeline_mode<synchronous>, transform_indices = @transform_2, window_bounds = array<i64: 1, 128>}, {pipeline_mode = #tpu.pipeline_mode<synchronous>, transform_indices = @transform_3, window_bounds = array<i64: 128, 128>}, {pipeline_mode = #tpu.pipeline_mode<synchronous>, transform_indices = @transform_4, window_bounds = array<i64: 1, 128>}, {pipeline_mode = #tpu.pipeline_mode<synchronous>, transform_indices = @transform_5, window_bounds = array<i64: 128, 128>}, {pipeline_mode = #tpu.pipeline_mode<synchronous>, transform_indices = @transform_6, window_bounds = array<i64: 1, 128>}, {transform_indices = @transform_7, window_bounds = array<i64: 8, 128>}]} {
    %c0 = arith.constant 0 : index
    %c0_0 = arith.constant 0 : index
    %0 = vector.load %arg1[%c0, %c0_0] : memref<8x8xi32, #tpu.memory_space<vmem>>, vector<8x8xi32>
    %cst = arith.constant 0.000000e+00 : f32
    %1 = vector.broadcast %cst : f32 to vector<8x128xf32>
    %2 = tpu.iota {dimensions = array<i32: 2>} : vector<8x8x128xi32>
    %3 = vector.shape_cast %0 : vector<8x8xi32> to vector<8x8x1xi32>
    %4 = vector.broadcast %3 : vector<8x8x1xi32> to vector<8x8x128xi32>
    %5 = arith.cmpi eq, %4, %2 : vector<8x8x128xi32>
    %6 = arith.extui %5 : vector<8x8x128xi1> to vector<8x8x128xi32>
    %7 = arith.sitofp %6 : vector<8x8x128xi32> to vector<8x8x128xf32>
    %cst_1 = arith.constant dense<0.000000e+00> : vector<8x128xf32>
    %8 = vector.multi_reduction <add>, %7, %cst_1 [1] : vector<8x8x128xf32> to vector<8x128xf32>
    %9 = arith.addf %1, %8 : vector<8x128xf32>
    %c0_2 = arith.constant 0 : index
    %c0_3 = arith.constant 0 : index
    %10 = vector.load %arg2[%c0_2, %c0_3] : memref<128x128xf32, #tpu.memory_space<vmem>>, vector<128x128xf32>
    %cst_4 = arith.constant dense<0.000000e+00> : vector<8x128xf32>
    %11 = tpu.matmul %9, %10, %cst_4 {dimension_numbers = #tpu.dot_dimension_numbers<[1], [0], [0], [1], [0, 0, 1, 1], [], []>} : vector<8x128xf32>, vector<128x128xf32>, vector<8x128xf32> -> vector<8x128xf32>
    %cst_5 = arith.constant 1.250000e-01 : f32
    %12 = vector.broadcast %cst_5 : f32 to vector<8x128xf32>
    %13 = arith.mulf %11, %12 : vector<8x128xf32>
    %c0_6 = arith.constant 0 : index
    %c0_7 = arith.constant 0 : index
    %14 = vector.load %arg3[%c0_6, %c0_7] : memref<1x128xf32, #tpu.memory_space<vmem>>, vector<1x128xf32>
    %15 = vector.broadcast %14 : vector<1x128xf32> to vector<8x128xf32>
    %16 = arith.addf %13, %15 : vector<8x128xf32>
    %cst_8 = arith.constant 0.000000e+00 : f32
    %17 = vector.broadcast %cst_8 : f32 to vector<8x128xf32>
    %18 = arith.maximumf %16, %17 : vector<8x128xf32>
    %c0_9 = arith.constant 0 : index
    %c0_10 = arith.constant 0 : index
    %19 = vector.load %arg4[%c0_9, %c0_10] : memref<128x128xf32, #tpu.memory_space<vmem>>, vector<128x128xf32>
    %cst_11 = arith.constant dense<0.000000e+00> : vector<8x128xf32>
    %20 = tpu.matmul %18, %19, %cst_11 {dimension_numbers = #tpu.dot_dimension_numbers<[1], [0], [0], [1], [0, 0, 1, 1], [], []>} : vector<8x128xf32>, vector<128x128xf32>, vector<8x128xf32> -> vector<8x128xf32>
    %c0_12 = arith.constant 0 : index
    %c0_13 = arith.constant 0 : index
    %21 = vector.load %arg5[%c0_12, %c0_13] : memref<1x128xf32, #tpu.memory_space<vmem>>, vector<1x128xf32>
    %22 = vector.broadcast %21 : vector<1x128xf32> to vector<8x128xf32>
    %23 = arith.addf %20, %22 : vector<8x128xf32>
    %cst_14 = arith.constant 0.000000e+00 : f32
    %24 = vector.broadcast %cst_14 : f32 to vector<8x128xf32>
    %25 = arith.maximumf %23, %24 : vector<8x128xf32>
    %c0_15 = arith.constant 0 : index
    %c0_16 = arith.constant 0 : index
    %26 = vector.load %arg6[%c0_15, %c0_16] : memref<128x128xf32, #tpu.memory_space<vmem>>, vector<128x128xf32>
    %cst_17 = arith.constant dense<0.000000e+00> : vector<8x128xf32>
    %27 = tpu.matmul %25, %26, %cst_17 {dimension_numbers = #tpu.dot_dimension_numbers<[1], [0], [0], [1], [0, 0, 1, 1], [], []>} : vector<8x128xf32>, vector<128x128xf32>, vector<8x128xf32> -> vector<8x128xf32>
    %c0_18 = arith.constant 0 : index
    %c0_19 = arith.constant 0 : index
    %28 = vector.load %arg7[%c0_18, %c0_19] : memref<1x128xf32, #tpu.memory_space<vmem>>, vector<1x128xf32>
    %29 = vector.broadcast %28 : vector<1x128xf32> to vector<8x128xf32>
    %30 = arith.addf %27, %29 : vector<8x128xf32>
    %31 = arith.negf %30 : vector<8x128xf32>
    %32 = math.exp %31 : vector<8x128xf32>
    %cst_20 = arith.constant 1.000000e+00 : f32
    %33 = vector.broadcast %cst_20 : f32 to vector<8x128xf32>
    %34 = arith.addf %33, %32 : vector<8x128xf32>
    %35 = arith.divf %33, %34 : vector<8x128xf32>
    %c0_21 = arith.constant 0 : index
    %c0_22 = arith.constant 0 : index
    %36 = vector.load %arg8[%c0_21, %c0_22] : memref<8x128xf32, #tpu.memory_space<vmem>>, vector<8x128xf32>
    tpu.vector_store %arg8[%c0_21, %c0_22], %35 {strides = array<i32>} : memref<8x128xf32, #tpu.memory_space<vmem>>, vector<8x128xf32>,
    return
  }
  func.func @transform_0(%arg0: i32) -> (i32, i32) {
    %c0_i32 = arith.constant 0 : i32
    %c0_i32_0 = arith.constant 0 : i32
    return %arg0, %c0_i32 : i32, i32
  }
  func.func @transform_1(%arg0: i32) -> (i32, i32) {
    %c0_i32 = arith.constant 0 : i32
    %c0_i32_0 = arith.constant 0 : i32
    %c0_i32_1 = arith.constant 0 : i32
    return %c0_i32, %c0_i32_0 : i32, i32
  }
  func.func @transform_2(%arg0: i32) -> (i32, i32) {
    %c0_i32 = arith.constant 0 : i32
    %c0_i32_0 = arith.constant 0 : i32
    %c0_i32_1 = arith.constant 0 : i32
    return %c0_i32, %c0_i32_0 : i32, i32
  }
  func.func @transform_3(%arg0: i32) -> (i32, i32) {
    %c0_i32 = arith.constant 0 : i32
    %c0_i32_0 = arith.constant 0 : i32
    %c0_i32_1 = arith.constant 0 : i32
    return %c0_i32, %c0_i32_0 : i32, i32
  }
  func.func @transform_4(%arg0: i32) -> (i32, i32) {
    %c0_i32 = arith.constant 0 : i32
    %c0_i32_0 = arith.constant 0 : i32
    %c0_i32_1 = arith.constant 0 : i32
    return %c0_i32, %c0_i32_0 : i32, i32
  }
  func.func @transform_5(%arg0: i32) -> (i32, i32) {
    %c0_i32 = arith.constant 0 : i32
    %c0_i32_0 = arith.constant 0 : i32
    %c0_i32_1 = arith.constant 0 : i32
    return %c0_i32, %c0_i32_0 : i32, i32
  }
  func.func @transform_6(%arg0: i32) -> (i32, i32) {
    %c0_i32 = arith.constant 0 : i32
    %c0_i32_0 = arith.constant 0 : i32
    %c0_i32_1 = arith.constant 0 : i32
    return %c0_i32, %c0_i32_0 : i32, i32
  }
  func.func @transform_7(%arg0: i32) -> (i32, i32) {
    %c0_i32 = arith.constant 0 : i32
    %c0_i32_0 = arith.constant 0 : i32
    return %arg0, %c0_i32 : i32, i32
  }
}

</mosaic_0001>

<bundles_post_ra>
// kernel: tpu_custom_call.1
= control target key start
LH: loop header
LB: loop body
LE: loop exit
PB: predicated region body
PF: predicated region fallthrough
CT: control target
= control target key end

     0   :  { %12 = vsyncpa [#allocation3], 0  ;;  %s1673_s0 = inlined_call_operand.vmem [shape: s32[16,8], index: 0, kind: input, shape index: {}]   ;;  %s1674_s1 = inlined_call_operand.hbm [shape: f32[128,128], index: 1, kind: input, shape index: {}]   ;;  %s1675_s2 = inlined_call_operand.vmem [shape: f32[1,128], index: 2, kind: input, shape index: {}]   ;;  %s1676_s3 = inlined_call_operand.hbm [shape: f32[128,128], index: 3, kind: input, shape index: {}]   ;;  %s1677_s4 = inlined_call_operand.vmem [shape: f32[1,128], index: 4, kind: input, shape index: {}]   ;;  %s1678_s5 = inlined_call_operand.hbm [shape: f32[128,128], index: 5, kind: input, shape index: {}]   ;;  %s1679_s6 = inlined_call_operand.vmem [shape: f32[1,128], index: 6, kind: input, shape index: {}]   ;;  %s1680_s7 = inlined_call_operand.hbm [shape: f32[16,128], index: 7, kind: output, shape index: {}]  }
   0x1   :  { %13 = vsyncpa [#allocation6], 0 }
   0x2   :  { %14 = vsyncpa [#allocation4], 0 }
   0x3   :  { %16 = vsyncpa [#allocation4 + $0x1], 0  ;;  %s1414_s24 = smov 0   ;;  %s1416_s25 = smov 0  }
   0x4   :  { %s1418_s26 = smov 0   ;;  %s1420_s27 = smov 0  }
   0x5 LB: > { %1687 = sst [smem:[#allocation12_spill]] %s1359_s26  ;;  %s1435_s28 = sadd.s32 4294967295, %s1363_s27   ;;  %s1363_s27 = sphi %s1420_s27, %s1702_s27   ;;  %s1359_s26 = sphi %s1418_s26, %s1704_s26   ;;  %s1355_s25 = sphi %s1416_s25, %s1706_s25   ;;  %s1351_s24 = sphi %s1414_s24, %s1705_s24  }
   0x6   : > { %s874_s29 = sadd.s32 4294967294, %s1363_s27   ;;  %s1439_s30 = sadd.s32 1, %s1363_s27  }
   0x7   : > { %1688 = sst [smem:[#allocation13_spill]] %s1439_s30  ;;  %s181_s8 = sadd.s32 1, %s1359_s26 }
   0x8   : > { %s178_s9 = ssub.s32 %s1363_s27, %s1439_s30  ;;  %p191_p0 = scmp.ne.s32.totalorder %s1359_s26, %s1355_s25 }
   0x9   : > { %p179_p1 = scmp.eq.s32.totalorder %s178_s9, 0  ;;  %p192_p2 = scmp.eq.s32.totalorder %s1435_s28, 1 }
   0xa   : > { %p197_p3 = scmp.ne.s32.totalorder %s1355_s25, %s1351_s24  ;;  %p198_p4 = scmp.eq.s32.totalorder %s874_s29, 1 }
   0xb   : > { %s1450_s10 = scalar_select %p179_p1, %s1359_s26, %s181_s8  }
   0xc   : > { %p1452_p5 = por %p192_p2, %p191_p0  ;;  %p1456_p6 = por %p198_p4, %p197_p3 }
   0xd   : > { %1689 = sst [smem:[#allocation14_spill]] %s1450_s10  ;;  %p875_p7 = scmp.ge.s32.totalorder %s1363_s27, 1 }
   0xe   : > { %s1690_s11 = scalar_select %p1452_p5, 1, 0 }
   0xf   : > { %s1691_s12 = scalar_select %p1456_p6, 1, 0 }
  0x10   : > { %p205_p8 = scmp.lt.s32.totalorder %s1363_s27, 3  ;;  %p1681_p9 = scmp.eq.s32.totalorder %s1435_s28, 0 }
  0x11   : > { %s1365_s14 = smov [#allocation5]   ;;  %s1366_s17 = smov [#allocation2]  }
  0x12   : > { %p1463_p10 = pnand %p875_p7, %p205_p8  ;;  %s233_s15 = sshll.u32 %s1365_s14, 4  ;;  %s1469_s15 = int_to_ptr.vmem [resolvable:$true] %s233_s15 }
  0x13   : > { %s217_s18 = sshll.u32 %s1366_s17, 4  ;;  %s1367_s19 = smov [#allocation7]   ;;  %s1477_s18 = int_to_ptr.vmem [resolvable:$true] %s217_s18 }
  0x14   : > { %s1692_s13 = scalar_select %p1463_p10, 1, 0 }
  0x15   : > { %p1144_p11 = pneg %p1463_p10  ;;  %s1479_s20 = sshll.u32 %s1367_s19, 4  ;;  %s250_s20 = int_to_ptr.vmem [resolvable:$true] %s1479_s20 }
  0x16   : > { %s1209_s23 = scalar_lea.hbm %s1676_s3, 2048 }
  0x17   : > { %p1473_p12 = pnand %p1681_p9, %p1144_p11  ;;  %p1210_p13 = scmp.ne.s32.totalorder %s1676_s3, %s1209_s23 }
  0x18   : > { %p1216_p3 = scmp.lt.u32.totalorder %s1209_s23, %s1676_s3 }
  0x19   : > { %p1489_p0 = pneg %p1473_p12 }
  0x1b   : > { %p1212_p1 = pnand %p1489_p0, %p1210_p13 }
  0x1d   : > { %p1213_p2 = pneg %p1212_p1 }
  0x1f   : > { %p1218_p4 = pnand %p1216_p3, %p1213_p2 }
  0x21   : > { %1221 = shalt.err (!%p1218_p4)
}
  0x22   : > { %s1222_s19 = scalar_lea.vmem %s1469_s15, 2048  ;;  %p1230_p9 = scmp.lt.s32.totalorder %s1469_s15, %s1469_s15 }
  0x23   : > { %p1223_p7 = scmp.ne.s32.totalorder %s1469_s15, %s1222_s19  ;;  %p1231_p6 = scmp.lt.s32.totalorder %s1222_s19, %s1222_s19 }
  0x25   : > { %p1225_p8 = pnand %p1223_p7, %p1489_p0  ;;  %p1232_p13 = por %p1231_p6, %p1230_p9 }
  0x27   : > { %p1226_p11 = pneg %p1225_p8 }
  0x29   : > { %p1233_p1 = pnand %p1232_p13, %p1226_p11 }
  0x2b   : > { %1236 = shalt.err (!%p1233_p1)
}
  0x2c   : > { %s1368_s21 = smov 128   ;;  %s1369_s22 = smov 8  }
  0x2d   : > { %1150 = dma.hbm_to_vmem [thread:$0]  (!%p1473_p12), %s1676_s3, 2048, %s1469_s15, [#allocation6], %s1368_s21, %s1368_s21, %s1369_s22  }
  0x2e   : > { %s1237_s17 = scalar_lea.hbm %s1674_s1, 2048 }
  0x2f   : > { %p1238_p6 = scmp.ne.s32.totalorder %s1674_s1, %s1237_s17  ;;  %p1244_p3 = scmp.lt.u32.totalorder %s1237_s17, %s1674_s1 }
  0x31   : > { %p1240_p9 = pnand %p1238_p6, %p1489_p0 }
  0x33   : > { %p1241_p2 = pneg %p1240_p9 }
  0x35   : > { %p1246_p4 = pnand %p1244_p3, %p1241_p2 }
  0x37   : > { %1249 = shalt.err (!%p1246_p4)
}
  0x38   : > { %s1250_s15 = scalar_lea.vmem %s1477_s18, 2048  ;;  %p1258_p13 = scmp.lt.s32.totalorder %s1477_s18, %s1477_s18 }
  0x39   : > { %p1251_p7 = scmp.ne.s32.totalorder %s1477_s18, %s1250_s15  ;;  %p1259_p1 = scmp.lt.s32.totalorder %s1250_s15, %s1250_s15 }
  0x3b   : > { %p1253_p8 = pnand %p1251_p7, %p1489_p0  ;;  %p1260_p6 = por %p1259_p1, %p1258_p13 }
  0x3d   : > { %p1254_p11 = pneg %p1253_p8 }
  0x3f   : > { %p1261_p9 = pnand %p1260_p6, %p1254_p11 }
  0x41   : > { %1264 = shalt.err (!%p1261_p9)
}
  0x42   : > { %1147 = dma.hbm_to_vmem [thread:$0]  (!%p1473_p12), %s1674_s1, 2048, %s1477_s18, [#allocation3], %s1368_s21, %s1368_s21, %s1369_s22  }
  0x43   : > { %s1265_s29 = scalar_lea.hbm %s1678_s5, 2048 }
  0x44   : > { %p1266_p2 = scmp.ne.s32.totalorder %s1678_s5, %s1265_s29  ;;  %p1272_p7 = scmp.lt.u32.totalorder %s1265_s29, %s1678_s5 }
  0x46   : > { %p1268_p3 = pnand %p1266_p2, %p1489_p0 }
  0x48   : > { %p1269_p4 = pneg %p1268_p3 }
  0x4a   : > { %p1274_p8 = pnand %p1272_p7, %p1269_p4 }
  0x4c   : > { %1277 = shalt.err (!%p1274_p8)
}
  0x4d   : > { %s1278_s15 = scalar_lea.vmem %s250_s20, 2048  ;;  %p1286_p6 = scmp.lt.s32.totalorder %s250_s20, %s250_s20 }
  0x4e   : > { %p1279_p11 = scmp.ne.s32.totalorder %s250_s20, %s1278_s15  ;;  %p1287_p9 = scmp.lt.s32.totalorder %s1278_s15, %s1278_s15 }
  0x50   : > { %p1281_p13 = pnand %p1279_p11, %p1489_p0  ;;  %p1288_p5 = por %p1287_p9, %p1286_p6 }
  0x52   : > { %p1282_p1 = pneg %p1281_p13 }
  0x54   : > { %p1289_p10 = pnand %p1288_p5, %p1282_p1 }
  0x56   : > { %1292 = shalt.err (!%p1289_p10)
}
  0x57   : > { %1153 = dma.hbm_to_vmem [thread:$0]  (!%p1473_p12), %s1678_s5, 2048, %s250_s20, [#allocation6], %s1368_s21, %s1368_s21, %s1369_s22  }
  0x58   : > { %p1695_p2 = scmp.ne.s32.totalorder %s1692_s13, 0 }
  0x59   : > { %p1696_p0 = scmp.eq.s32.totalorder (!%p1695_p2), %s1435_s28, 0 }
  0x5a   : > { %275 = sbr.rel (%p1695_p2) target bundleno = 941 (0x3ad), region = 48 }
  0x61   : > { %1338 = dma.done.wait (%p1696_p0), [#allocation3], 2048   ;;  %p1697_p3 = pmov %p1696_p0 }
  0x62   : > { %p1698_p5 = pmov %p1696_p0 }
  0x63   : > { %1340 = vsyncadd (%p1697_p3), [#allocation3], 4294965248 }
  0x64   : > { %1342 = dma.done.wait (%p1698_p5), [#allocation6], 4096   ;;  %p1699_p10 = pmov %p1696_p0 }
  0x65   : > { %p314_p4 = scmp.lt.s32.totalorder %s1435_s28, 1  ;;  %v319_v0 = vlaneseq  ;;  %v1370_v1 = vmov 0.0|0.0   ;;  %v457_v8 = vld [vmem:[#allocation2] sm:$0xff]  ;;  %v458_v9 = vld [vmem:[#allocation2 + $0x8] sm:$0xff]  ;;  %v459_v13 = vld [vmem:[#allocation2 + $0x10] sm:$0xff]  ;;  %vm1371_vm0 = vmmov 0  }
  0x66   : > { %1344 = vsyncadd (%p1699_p10), [#allocation6], 4294963200  ;;  %1058 = vmatprep.subr.bf16.mxu0 %v1370_v1  ;;  %1082 = vmatprep.subr.bf16.mxu1 %v1370_v1  ;;  %v460_v14 = vld [vmem:[#allocation2 + $0x18] sm:$0xff]  ;;  %v1059_v18 = vpack.c.bf16 %v458_v9, %v457_v8  ;;  %v461_v20 = vld [vmem:[#allocation2 + $0x20] sm:$0xff]  ;;  %v1372_v34 = vmov 0.0   ;;  %vm481_vm7 = vcmask 1041409  }
  0x67   : > { %s315_s13 = scalar_select %p314_p4, %s1435_s28, 1  ;;  %v322_v2 = vshrl.u32 %v319_v0, 7  ;;  %v1062_v19 = vpack.c.bf16 %v460_v14, %v459_v13  ;;  %v462_v21 = vld [vmem:[#allocation2 + $0x28] sm:$0xff]  ;;  %v463_v27 = vld [vmem:[#allocation2 + $0x30] sm:$0xff]  ;;  %v464_v28 = vld [vmem:[#allocation2 + $0x38] sm:$0xff]  ;;  %985 = vmatprep.mubr.msk.f32.mxu0 %vm1371_vm0, %v1372_v34  ;;  %1020 = vmatprep.mubr.msk.f32.mxu1 %vm1371_vm0, %v1372_v34  ;;  %v320_v63 = vand.u32 127, %v319_v0 }
  0x68   : > { %1060 = vmatpush3.bf16.msra.mxu0 %v1059_v18  ;;  %v1065_v26 = vpack.c.bf16 %v462_v21, %v461_v20  ;;  %v1068_v31 = vpack.c.bf16 %v464_v28, %v463_v27  ;;  %v465_v32 = vld [vmem:[#allocation2 + $0x40] sm:$0xff]  ;;  %v466_v33 = vld [vmem:[#allocation2 + $0x48] sm:$0xff]  ;;  %v467_v36 = vld [vmem:[#allocation2 + $0x50] sm:$0xff]  ;;  %vm483_vm10 = vcmask 1042434   ;;  %vm485_vm11 = vcmask 1043459   ;;  %s311_s14 = sand.u32 1, %s1355_s25  }
  0x69   : > { %s885_s16 = sshll.u32 %s315_s13, 3  ;;  %v337_v3 = vsub.s32 2, %v322_v2  ;;  %v323_v4 = vsub.s32 0, %v322_v2  ;;  %v344_v5 = vsub.s32 3, %v322_v2  ;;  %v330_v6 = vsub.s32 1, %v322_v2  ;;  %1061 = vmatprep.subr.bf16.mxu0 %v1370_v1  ;;  %v468_v37 = vld [vmem:[#allocation2 + $0x58] sm:$0xff] }
  0x6a   : > { %s317_s21 = scalar_lea.vmem %s1673_s0, %s885_s16  ;;  %v358_v12 = vsub.s32 5, %v322_v2  ;;  %v351_v17 = vsub.s32 4, %v322_v2  ;;  %v372_v24 = vsub.s32 7, %v322_v2  ;;  %v365_v25 = vsub.s32 6, %v322_v2  ;;  %v576_v38 = vld [vmem:[#allocation5] sm:$0xff]  ;;  %v577_v39 = vld [vmem:[#allocation5 + $0x8] sm:$0xff] }
  0x6b   : > { %v318_v7 = vld [vmem:[%s317_s21] sm:$0xff]  ;;  %v1071_v35 = vpack.c.bf16 %v466_v33, %v465_v32  ;;  %v578_v40 = vld [vmem:[#allocation5 + $0x10] sm:$0xff]  ;;  %v1083_v41 = vpack.c.bf16 %v577_v39, %v576_v38  ;;  %v579_v42 = vld [vmem:[#allocation5 + $0x18] sm:$0xff]  ;;  %v1074_v43 = vpack.c.bf16 %v468_v37, %v467_v36  ;;  %vm487_vm12 = vcmask 1044484   ;;  %s884_s17 = sshll.u32 %s311_s14, 3  ;;  %s899_s19 = sshll.u32 %s1435_s28, 7 }
  0x6c   : > { %v338_v10 = vrot.slane %v318_v7, %v337_v3  ;;  %v324_v11 = vrot.slane %v318_v7, %v323_v4  ;;  %v345_v15 = vrot.slane %v318_v7, %v344_v5  ;;  %v331_v16 = vrot.slane %v318_v7, %v330_v6  ;;  %1063 = vmatpush3.bf16.msra.mxu0 %v1062_v19  ;;  %v469_v44 = vld [vmem:[#allocation2 + $0x60] sm:$0xff]  ;;  %v470_v45 = vld [vmem:[#allocation2 + $0x68] sm:$0xff]  ;;  %v471_v50 = vld [vmem:[#allocation2 + $0x70] sm:$0xff]  ;;  %s313_s15 = scalar_lea.vmem [#allocation8], %s884_s17  ;;  %s1631_s16 = scalar_lea.hbm %s1680_s7, %s899_s19 }
  0x6d   : > { %v359_v22 = vrot.slane %v318_v7, %v358_v12  ;;  %v352_v23 = vrot.slane %v318_v7, %v351_v17  ;;  %1064 = vmatprep.subr.bf16.mxu0 %v1370_v1  ;;  %v373_v29 = vrot.slane %v318_v7, %v372_v24  ;;  %v366_v30 = vrot.slane %v318_v7, %v365_v25  ;;  %v580_v47 = vld [vmem:[#allocation5 + $0x20] sm:$0xff]  ;;  %v581_v48 = vld [vmem:[#allocation5 + $0x28] sm:$0xff]  ;;  %v472_v51 = vld [vmem:[#allocation2 + $0x78] sm:$0xff]  ;;  %s784_s18 = sshll.u32 %s313_s15, 4  ;;  %s771_s20 = scalar_lea.sflag [#allocation4], %s311_s14  ;;  %s1633_s18 = int_to_ptr.vmem [resolvable:$true] %s784_s18 }
  0x6e   : > { %340 = vbcast.lane.b32.xlu1 %v338_v10, 256  ;;  %326 = vbcast.lane.b32.xlu0 %v324_v11, 256  ;;  %v1086_v46 = vpack.c.bf16 %v579_v42, %v578_v40  ;;  %v1077_v49 = vpack.c.bf16 %v470_v45, %v469_v44  ;;  %v1089_v52 = vpack.c.bf16 %v581_v48, %v580_v47  ;;  %v582_v53 = vld [vmem:[#allocation5 + $0x30] sm:$0xff]  ;;  %v583_v54 = vld [vmem:[#allocation5 + $0x38] sm:$0xff]  ;;  %v584_v57 = vld [vmem:[#allocation5 + $0x40] sm:$0xff]  ;;  %vm489_vm13 = vcmask 1045509  }
  0x6f   : > { %1084 = vmatpush3.bf16.msra.mxu1 %v1083_v41  ;;  %v1080_v55 = vpack.c.bf16 %v472_v51, %v471_v50  ;;  %v1092_v56 = vpack.c.bf16 %v583_v54, %v582_v53  ;;  %v585_v58 = vld [vmem:[#allocation5 + $0x48] sm:$0xff]  ;;  %v586_v60 = vld [vmem:[#allocation5 + $0x50] sm:$0xff]  ;;  %v587_v61 = vld [vmem:[#allocation5 + $0x58] sm:$0xff]  ;;  %vm491_vm14 = vcmask 1046534   ;;  %vm493_vm15 = vcmask 1047559   ;;  %s1293_s9 = scalar_lea.vmem %s1633_s18, 128 }
  0x70   : > { %1066 = vmatpush3.bf16.msra.mxu0 %v1065_v26  ;;  %1085 = vmatprep.subr.bf16.mxu1 %v1370_v1  ;;  %v1095_v59 = vpack.c.bf16 %v585_v58, %v584_v57  ;;  %v1098_v62 = vpack.c.bf16 %v587_v61, %v586_v60  ;;  %p1294_p12 = scmp.ne.s32.totalorder %s1633_s18, %s1293_s9  ;;  %p1700_p7 = scmp.ne.s32.totalorder %s1690_s11, 0 }
  0x71   : > { %1067 = vmatprep.subr.bf16.mxu0 %v1370_v1  ;;  %s1373_s28 = smov [#allocation8]  }
  0x72   : > { %347 = vbcast.lane.b32.xlu1 %v345_v15, 256  ;;  %333 = vbcast.lane.b32.xlu0 %v331_v16, 256  ;;  %p1295_p8 = pnand %p1294_p12, %p1700_p7  ;;  %s1297_s21 = sshll.u32 %s1373_s28, 4  ;;  %s1298_s21 = int_to_ptr.vmem [resolvable:$false] %s1297_s21 }
  0x73   : > { %1087 = vmatpush3.bf16.msra.mxu1 %v1086_v46  ;;  %s1299_s22 = scalar_lea.vmem %s1298_s21, 256  ;;  %p1300_p13 = scmp.lt.s32.totalorder %s1633_s18, %s1298_s21 }
  0x74   : > { %1069 = vmatpush3.bf16.msra.mxu0 %v1068_v31  ;;  %1088 = vmatprep.subr.bf16.mxu1 %v1370_v1  ;;  %p1296_p11 = pneg %p1295_p8  ;;  %p1301_p1 = scmp.lt.s32.totalorder %s1299_s22, %s1293_s9 }
  0x75   : > { %1070 = vmatprep.subr.bf16.mxu0 %v1370_v1 }
  0x76   : > { %361 = vbcast.lane.b32.xlu1 %v359_v22, 256  ;;  %354 = vbcast.lane.b32.xlu0 %v352_v23, 256  ;;  %p1302_p6 = por %p1301_p1, %p1300_p13 }
  0x77   : > { %1090 = vmatpush3.bf16.msra.mxu1 %v1089_v52 }
  0x78   : > { %1072 = vmatpush3.bf16.msra.mxu0 %v1071_v35  ;;  %1091 = vmatprep.subr.bf16.mxu1 %v1370_v1  ;;  %p1303_p9 = pnand %p1302_p6, %p1296_p11 }
  0x79   : > { %1073 = vmatprep.subr.bf16.mxu0 %v1370_v1 }
  0x7a   : > { %375 = vbcast.lane.b32.xlu1 %v373_v29, 256  ;;  %368 = vbcast.lane.b32.xlu0 %v366_v30, 256 }
  0x7b   : > { %1093 = vmatpush3.bf16.msra.mxu1 %v1092_v56 }
  0x7c   : > { %1075 = vmatpush3.bf16.msra.mxu0 %v1074_v43  ;;  %1094 = vmatprep.subr.bf16.mxu1 %v1370_v1 }
  0x7d   : > { %1076 = vmatprep.subr.bf16.mxu0 %v1370_v1 }
  0x7f   : > { %1096 = vmatpush3.bf16.msra.mxu1 %v1095_v59 }
  0x80   : > { %1078 = vmatpush3.bf16.msra.mxu0 %v1077_v49  ;;  %1097 = vmatprep.subr.bf16.mxu1 %v1370_v1 }
  0x81   : > { %1079 = vmatprep.subr.bf16.mxu0 %v1370_v1 }
  0x83   : > { %1099 = vmatpush3.bf16.msra.mxu1 %v1098_v62 }
  0x84   : > { %1081 = vmatpush3.bf16.msra.mxu0 %v1080_v55  ;;  %1100 = vmatprep.subr.bf16.mxu1 %v1370_v1 }
  0x85   : > { %1106 = vmatprep.subr.bf16.mxu0 %v1370_v1 }
  0xe0   : > { %v341_v2 = vpop.permute.xlu1 %340  ;;  %v327_v3 = vpop.permute.xlu0 %326 }
  0xe1   : > { %vm379_vm1 = vcmp.eq.s32.totalorder %v341_v2, %v320_v63  ;;  %vm377_vm2 = vcmp.eq.s32.totalorder %v327_v3, %v320_v63 }
  0xe2   : > { %v888_v4 = vsel %vm379_vm1, 1.0, %v1372_v34  ;;  %v886_v5 = vsel %vm377_vm2, 1.0, %v1372_v34 }
  0xe3   : > { %v413_v6 = vrot.slane %v888_v4, 4  ;;  %v401_v7 = vrot.slane %v886_v5, 4 }
  0xe4   : > { %v348_v8 = vpop.permute.xlu1 %347  ;;  %v334_v9 = vpop.permute.xlu0 %333 }
  0xe5   : > { %v414_v10 = vadd.f32 %v888_v4, %v413_v6  ;;  %v402_v11 = vadd.f32 %v886_v5, %v401_v7  ;;  %vm380_vm3 = vcmp.eq.s32.totalorder %v348_v8, %v320_v63  ;;  %vm378_vm4 = vcmp.eq.s32.totalorder %v334_v9, %v320_v63 }
  0xe6   : > { %v889_v12 = vsel %vm380_vm3, 1.0, %v1372_v34  ;;  %v887_v0 = vsel %vm378_vm4, 1.0, %v1372_v34 }
  0xe7   : > { %v415_v13 = vrot.slane %v414_v10, 2  ;;  %v403_v14 = vrot.slane %v402_v11, 2  ;;  %v419_v15 = vrot.slane %v889_v12, 4  ;;  %v407_v16 = vrot.slane %v887_v0, 4 }
  0xe8   : > { %v362_v17 = vpop.permute.xlu1 %361  ;;  %v355_v18 = vpop.permute.xlu0 %354 }
  0xe9   : > { %v404_v19 = vadd.f32 %v403_v14, %v402_v11  ;;  %v420_v20 = vadd.f32 %v889_v12, %v419_v15  ;;  %v408_v21 = vadd.f32 %v887_v0, %v407_v16  ;;  %vm382_vm5 = vcmp.eq.s32.totalorder %v362_v17, %v320_v63  ;;  %v588_v11 = vld [vmem:[#allocation5 + $0x60] sm:$0xff]  ;;  %v589_v12 = vld [vmem:[#allocation5 + $0x68] sm:$0xff]  ;;  %v591_v14 = vld [vmem:[#allocation5 + $0x78] sm:$0xff] }
  0xea   : > { %vm381_vm6 = vcmp.eq.s32.totalorder %v355_v18, %v320_v63  ;;  %v416_v22 = vadd.f32 %v415_v13, %v414_v10  ;;  %v891_v25 = vsel %vm382_vm5, 1.0, %v1372_v34  ;;  %v1101_v0 = vpack.c.bf16 %v589_v12, %v588_v11  ;;  %v590_v13 = vld [vmem:[#allocation5 + $0x70] sm:$0xff]  ;;  %v670_v16 = vld [vmem:[#allocation7] sm:$0xff]  ;;  %v671_v17 = vld [vmem:[#allocation7 + $0x8] sm:$0xff] }
  0xeb   : > { %v421_v23 = vrot.slane %v420_v20, 2  ;;  %v409_v24 = vrot.slane %v408_v21, 2  ;;  %v890_v26 = vsel %vm381_vm6, 1.0, %v1372_v34  ;;  %v405_v29 = vrot.slane %v404_v19, 1  ;;  %v672_v18 = vld [vmem:[#allocation7 + $0x10] sm:$0xff] }
  0xec   : > { %v376_v27 = vpop.permute.xlu1 %375  ;;  %v369_v28 = vpop.permute.xlu0 %368  ;;  %v431_v32 = vrot.slane %v891_v25, 4  ;;  %v425_v33 = vrot.slane %v890_v26, 4  ;;  %v417_v35 = vrot.slane %v416_v22, 1  ;;  %1102 = vmatpush3.bf16.msra.mxu1 %v1101_v0  ;;  %v1104_v15 = vpack.c.bf16 %v591_v14, %v590_v13 }
  0xed   : > { %v422_v30 = vadd.f32 %v421_v23, %v420_v20  ;;  %v410_v31 = vadd.f32 %v409_v24, %v408_v21  ;;  %vm384_vm8 = vcmp.eq.s32.totalorder %v376_v27, %v320_v63  ;;  %vm383_vm9 = vcmp.eq.s32.totalorder %v369_v28, %v320_v63  ;;  %1103 = vmatprep.subr.bf16.mxu1 %v1370_v1  ;;  %v673_v20 = vld [vmem:[#allocation7 + $0x18] sm:$0xff]  ;;  %v676_v24 = vld [vmem:[#allocation7 + $0x30] sm:$0xff]  ;;  %v678_v27 = vld [vmem:[#allocation7 + $0x40] sm:$0xff] }
  0xee   : > { %v893_v37 = vsel %vm384_vm8, 1.0, %v1372_v34  ;;  %v892_v38 = vsel %vm383_vm9, 1.0, %v1372_v34  ;;  %v432_v39 = vadd.f32 %v891_v25, %v431_v32  ;;  %v426_v40 = vadd.f32 %v890_v26, %v425_v33  ;;  %v677_v25 = vld [vmem:[#allocation7 + $0x38] sm:$0xff]  ;;  %v679_v28 = vld [vmem:[#allocation7 + $0x48] sm:$0xff]  ;;  %v682_v33 = vld [vmem:[#allocation7 + $0x60] sm:$0xff] }
  0xef   : > { %v411_v36 = vrot.slane %v410_v31, 1  ;;  %v443_v41 = vrot.slane %v893_v37, 4  ;;  %v437_v42 = vrot.slane %v892_v38, 4  ;;  %v406_v43 = vadd.f32 %v405_v29, %v404_v19 }
  0xf0   : > { %v423_v44 = vrot.slane %v422_v30, 1  ;;  %v433_v46 = vrot.slane %v432_v39, 2  ;;  %v427_v47 = vrot.slane %v426_v40, 2  ;;  %v418_v50 = vadd.f32 %v417_v35, %v416_v22  ;;  %1105 = vmatpush3.bf16.msra.mxu1 %v1104_v15  ;;  %v675_v22 = vld [vmem:[#allocation7 + $0x28] sm:$0xff] }
  0xf1   : > { %v412_v45 = vadd.f32 %v411_v36, %v410_v31  ;;  %v444_v48 = vadd.f32 %v893_v37, %v443_v41  ;;  %v438_v49 = vadd.f32 %v892_v38, %v437_v42  ;;  %v1107_v19 = vpack.c.bf16 %v671_v17, %v670_v16  ;;  %v681_v31 = vld [vmem:[#allocation7 + $0x58] sm:$0xff]  ;;  %v683_v35 = vld [vmem:[#allocation7 + $0x68] sm:$0xff]  ;;  %v894_v38 = vld [vmem:[%s1675_s2] ss:$0 sm:$0xff] }
  0xf2   : > { %v434_v52 = vadd.f32 %v433_v46, %v432_v39  ;;  %v428_v53 = vadd.f32 %v427_v47, %v426_v40  ;;  %v424_v56 = vadd.f32 %v423_v44, %v422_v30  ;;  %v1110_v21 = vpack.c.bf16 %v673_v20, %v672_v18  ;;  %v680_v30 = vld [vmem:[#allocation7 + $0x50] sm:$0xff]  ;;  %v685_v44 = vld [vmem:[#allocation7 + $0x78] sm:$0xff]  ;;  %v895_v46 = vld [vmem:[%s1677_s4] ss:$0 sm:$0xff] }
  0xf3   : > { %v482_v51 = vsel %vm481_vm7, %v412_v45, %v406_v43  ;;  %v445_v54 = vrot.slane %v444_v48, 2  ;;  %v439_v55 = vrot.slane %v438_v49, 2  ;;  %v1116_v26 = vpack.c.bf16 %v677_v25, %v676_v24  ;;  %v684_v43 = vld [vmem:[#allocation7 + $0x70] sm:$0xff] }
  0xf4   : > { %v484_v57 = vsel %vm483_vm10, %v418_v50, %v482_v51  ;;  %v435_v58 = vrot.slane %v434_v52, 1  ;;  %v429_v59 = vrot.slane %v428_v53, 1  ;;  %v1119_v29 = vpack.c.bf16 %v679_v28, %v678_v27  ;;  %v896_v50 = vld [vmem:[%s1679_s6] ss:$0 sm:$0xff] }
  0xf5   : > { %v446_v60 = vadd.f32 %v445_v54, %v444_v48  ;;  %v440_v61 = vadd.f32 %v439_v55, %v438_v49  ;;  %v486_v62 = vsel %vm485_vm11, %v424_v56, %v484_v57  ;;  %v1122_v32 = vpack.c.bf16 %v681_v31, %v680_v30 }
  0xf6   : > { %v436_v63 = vadd.f32 %v435_v58, %v434_v52  ;;  %v430_v2 = vadd.f32 %v429_v59, %v428_v53  ;;  %v1125_v36 = vpack.c.bf16 %v683_v35, %v682_v33  ;;  %v1128_v45 = vpack.c.bf16 %v685_v44, %v684_v43 }
  0xf7   : > { %v447_v3 = vrot.slane %v446_v60, 1  ;;  %v441_v4 = vrot.slane %v440_v61, 1 }
  0xf8   : > { %v488_v7 = vsel %vm487_vm12, %v430_v2, %v486_v62 }
  0xf9   : > { %v442_v5 = vadd.f32 %v441_v4, %v440_v61  ;;  %v448_v6 = vadd.f32 %v447_v3, %v446_v60  ;;  %v490_v8 = vsel %vm489_vm13, %v436_v63, %v488_v7 }
  0xfb   : > { %v492_v9 = vsel %vm491_vm14, %v442_v5, %v490_v8 }
  0xfc   : > { %v494_v10 = vsel %vm493_vm15, %v448_v6, %v492_v9 }
  0xfd   : > { %986 = vmatmul.mubr.f32.vlgmr.msra.gmra.mrb[0].mxu0 %v494_v10 }
  0xfe   : > { %1055 = vmatprep.mubr.msk.f32.mxu0 %vm1371_vm0, %v1372_v34  ;;  %1108 = vmatpush3.bf16.msra.mxu0 %v1107_v19  ;;  %v674_v34 = vld [vmem:[#allocation7 + $0x20] sm:$0xff] }
  0xff   : > { %1109 = vmatprep.subr.bf16.mxu0 %v1370_v1  ;;  %v1113_v23 = vpack.c.bf16 %v675_v22, %v674_v34 }
 0x102   : > { %1111 = vmatpush3.bf16.msra.mxu0 %v1110_v21 }
 0x103   : > { %1112 = vmatprep.subr.bf16.mxu0 %v1370_v1 }
 0x106   : > { %1114 = vmatpush3.bf16.msra.mxu0 %v1113_v23 }
 0x107   : > { %1115 = vmatprep.subr.bf16.mxu0 %v1370_v1 }
 0x10a   : > { %1117 = vmatpush3.bf16.msra.mxu0 %v1116_v26 }
 0x10b   : > { %1118 = vmatprep.subr.bf16.mxu0 %v1370_v1 }
 0x10e   : > { %1120 = vmatpush3.bf16.msra.mxu0 %v1119_v29 }
 0x10f   : > { %1121 = vmatprep.subr.bf16.mxu0 %v1370_v1 }
 0x112   : > { %1123 = vmatpush3.bf16.msra.mxu0 %v1122_v32 }
 0x113   : > { %1124 = vmatprep.subr.bf16.mxu0 %v1370_v1 }
 0x116   : > { %1126 = vmatpush3.bf16.msra.mxu0 %v1125_v36 }
 0x117   : > { %1127 = vmatprep.subr.bf16.mxu0 %v1370_v1 }
 0x11a   : > { %1129 = vmatpush3.bf16.msra.mxu0 %v1128_v45 }
 0x1d0   : > { %v562_v37 = vpop.f32.mrb[0].mxu0 }
 0x1d1   : > { %v566_v39 = vmul.f32 0.125, %v562_v37  ;;  %v987_v40 = vpop.f32.mrb[1].mxu0 }
 0x1d3   : > { %v574_v41 = vadd.f32 %v894_v38, %v566_v39 }
 0x1d5   : > { %v575_v42 = vmax.f32 %v574_v41, 0.0 }
 0x1d7   : > { %1021 = vmatmul.mubr.f32.vlgmr.msra.gmra.mrb[0].mxu1 %v575_v42 }
 0x2aa   : > { %v665_v1 = vpop.f32.mrb[0].mxu1 }
 0x2ab   : > { %v666_v47 = vadd.f32 %v895_v46, %v665_v1  ;;  %v1022_v48 = vpop.f32.mrb[1].mxu1 }
 0x2ad   : > { %v669_v49 = vmax.f32 %v666_v47, 0.0 }
 0x2af   : > { %1056 = vmatmul.mubr.f32.vlgmr.msra.gmra.mrb[2].mxu0 %v669_v49 }
 0x382   : > { %v759_v51 = vpop.f32.mrb[2].mxu0 }
 0x383   : > { %v760_v52 = vadd.f32 %v896_v50, %v759_v51  ;;  %v1057_v53 = vpop.f32.mrb[3].mxu0 }
 0x385   : > { %v897_v54 = vmul.f32 -1.442695, %v760_v52 }
 0x387   : > { %1205 = vpow2.f32 %v897_v54 }
 0x391   : > { %v1206_v55 = vpop.eup %1205 }
 0x392   : > { %v766_v56 = vadd.f32 1.0, %v1206_v55 }
 0x394   : > { %1207 = vrcp.f32 %v766_v56 }
 0x39e   : > { %v1208_v57 = vpop.eup %1207 }
 0x39f   : > { %769 = vst [vmem:[%s313_s15] sm:$0xff] %v1208_v57 }
 0x3a0   : > { %1306 = shalt.err (!%p1303_p9)
}
 0x3a1   : > { %s1307_s30 = scalar_lea.hbm %s1631_s16, 128  ;;  %s1311_s29 = scalar_lea.hbm %s1680_s7, 256 }
 0x3a2   : > { %p1308_p2 = scmp.ne.s32.totalorder %s1631_s16, %s1307_s30  ;;  %p1312_p5 = scmp.lt.u32.totalorder %s1631_s16, %s1680_s7 }
 0x3a3   : > { %p1313_p10 = scmp.lt.u32.totalorder %s1311_s29, %s1307_s30  ;;  %p1315_p12 = scmp.lt.u32.totalorder %s1307_s30, %s1631_s16 }
 0x3a4   : > { %p1309_p0 = pnand %p1308_p2, %p1700_p7 }
 0x3a5   : > { %p1314_p4 = por %p1313_p10, %p1312_p5 }
 0x3a6   : > { %p1310_p3 = pneg %p1309_p0 }
 0x3a7   : > { %p1316_p8 = por %p1315_p12, %p1314_p4 }
 0x3a9   : > { %p1317_p11 = pnand %p1316_p8, %p1310_p3 }
 0x3ab   : > { %1320 = shalt.err (!%p1317_p11)
}
 0x3ac   : > { %1142 = dma.vmem_to_hbm [thread:$0]  (%p1700_p7), %s1633_s18, 128, %s1631_s16, %s771_s20  }
 0x3ad PF: > { %p1164_p13 = scmp.ge.s32.totalorder %s1363_s27, 2  ;;  %s796_s17 = sand.u32 1, %s1351_s24  }
 0x3ae   : > { %p1701_p1 = scmp.ne.s32.totalorder %s1691_s12, 0  ;;  %s797_s19 = scalar_lea.sflag [#allocation4], %s796_s17 }
 0x3b0   : > { %p1155_p6 = pnand %p1164_p13, %p1701_p1 }
 0x3b2   : > { %1346 = dma.done.wait (!%p1155_p6), %s797_s19, 128  }
 0x3b3   : > { %1348 = vsyncadd (!%p1155_p6), %s797_s19, 4294967168  ;;  %s1702_s27 = sld [smem:[#allocation13_spill]]  ;;  %s1703_s15 = sld [smem:[#allocation12_spill]] }
 0x3b4   : > { %s1704_s26 = sld [smem:[#allocation14_spill]]  ;;  %s1705_s24 = smov %s1355_s25 }
 0x3b9   : > { %p19_p9 = scmp.ge.s32.totalorder %s1702_s27, 4   ;;  %s1706_s25 = smov %s1703_s15 }
 0x3bb   :  { %21 = sbr.rel (!%p19_p9) target bundleno = 5 (0x5), region = 96 }
 0x3c2   :  { %802 = vsyncpa [#allocation3], 1 }
 0x3c3   :  { %804 = vsyncpa [#allocation3 + $0x1], 1 }
 0x3c4   :  { %805 = vsyncpa [#allocation6], 1 }
 0x3c5   :  { %806 = vsyncpa [#allocation4], 1 }
 0x3c6   :  { %808 = vsyncpa [#allocation4 + $0x1], 1 }

// kernel: tpu_custom_call.1
= control target key start
LH: loop header
LB: loop body
LE: loop exit
PB: predicated region body
PF: predicated region fallthrough
CT: control target
= control target key end

     0   :  { %12 = vsyncpa [#allocation3], 0  ;;  %s1673_s0 = inlined_call_operand.vmem [shape: s32[16,8], index: 0, kind: input, shape index: {}]   ;;  %s1674_s1 = inlined_call_operand.hbm [shape: f32[128,128], index: 1, kind: input, shape index: {}]   ;;  %s1675_s2 = inlined_call_operand.vmem [shape: f32[1,128], index: 2, kind: input, shape index: {}]   ;;  %s1676_s3 = inlined_call_operand.hbm [shape: f32[128,128], index: 3, kind: input, shape index: {}]   ;;  %s1677_s4 = inlined_call_operand.vmem [shape: f32[1,128], index: 4, kind: input, shape index: {}]   ;;  %s1678_s5 = inlined_call_operand.hbm [shape: f32[128,128], index: 5, kind: input, shape index: {}]   ;;  %s1679_s6 = inlined_call_operand.vmem [shape: f32[1,128], index: 6, kind: input, shape index: {}]   ;;  %s1680_s7 = inlined_call_operand.hbm [shape: f32[16,128], index: 7, kind: output, shape index: {}]  }
   0x1   :  { %13 = vsyncpa [#allocation6], 0 }
   0x2   :  { %14 = vsyncpa [#allocation4], 0 }
   0x3   :  { %16 = vsyncpa [#allocation4 + $0x1], 0  ;;  %s1414_s24 = smov 0   ;;  %s1416_s25 = smov 0  }
   0x4   :  { %s1418_s26 = smov 0   ;;  %s1420_s27 = smov 0  }
   0x5 LB: > { %1687 = sst [smem:[#allocation12_spill]] %s1359_s26  ;;  %s1435_s28 = sadd.s32 4294967295, %s1363_s27   ;;  %s1363_s27 = sphi %s1420_s27, %s1702_s27   ;;  %s1359_s26 = sphi %s1418_s26, %s1704_s26   ;;  %s1355_s25 = sphi %s1416_s25, %s1706_s25   ;;  %s1351_s24 = sphi %s1414_s24, %s1705_s24  }
   0x6   : > { %s874_s29 = sadd.s32 4294967294, %s1363_s27   ;;  %s1439_s30 = sadd.s32 1, %s1363_s27  }
   0x7   : > { %1688 = sst [smem:[#allocation13_spill]] %s1439_s30  ;;  %s181_s8 = sadd.s32 1, %s1359_s26 }
   0x8   : > { %s178_s9 = ssub.s32 %s1363_s27, %s1439_s30  ;;  %p191_p0 = scmp.ne.s32.totalorder %s1359_s26, %s1355_s25 }
   0x9   : > { %p179_p1 = scmp.eq.s32.totalorder %s178_s9, 0  ;;  %p192_p2 = scmp.eq.s32.totalorder %s1435_s28, 1 }
   0xa   : > { %p197_p3 = scmp.ne.s32.totalorder %s1355_s25, %s1351_s24  ;;  %p198_p4 = scmp.eq.s32.totalorder %s874_s29, 1 }
   0xb   : > { %s1450_s10 = scalar_select %p179_p1, %s1359_s26, %s181_s8  }
   0xc   : > { %p1452_p5 = por %p192_p2, %p191_p0  ;;  %p1456_p6 = por %p198_p4, %p197_p3 }
   0xd   : > { %1689 = sst [smem:[#allocation14_spill]] %s1450_s10  ;;  %p875_p7 = scmp.ge.s32.totalorder %s1363_s27, 1 }
   0xe   : > { %s1690_s11 = scalar_select %p1452_p5, 1, 0 }
   0xf   : > { %s1691_s12 = scalar_select %p1456_p6, 1, 0 }
  0x10   : > { %p205_p8 = scmp.lt.s32.totalorder %s1363_s27, 3  ;;  %p1681_p9 = scmp.eq.s32.totalorder %s1435_s28, 0 }
  0x11   : > { %s1365_s14 = smov [#allocation5]   ;;  %s1366_s17 = smov [#allocation2]  }
  0x12   : > { %p1463_p10 = pnand %p875_p7, %p205_p8  ;;  %s233_s15 = sshll.u32 %s1365_s14, 4  ;;  %s1469_s15 = int_to_ptr.vmem [resolvable:$true] %s233_s15 }
  0x13   : > { %s217_s18 = sshll.u32 %s1366_s17, 4  ;;  %s1367_s19 = smov [#allocation7]   ;;  %s1477_s18 = int_to_ptr.vmem [resolvable:$true] %s217_s18 }
  0x14   : > { %s1692_s13 = scalar_select %p1463_p10, 1, 0 }
  0x15   : > { %p1144_p11 = pneg %p1463_p10  ;;  %s1479_s20 = sshll.u32 %s1367_s19, 4  ;;  %s250_s20 = int_to_ptr.vmem [resolvable:$true] %s1479_s20 }
  0x16   : > { %s1209_s23 = scalar_lea.hbm %s1676_s3, 2048 }
  0x17   : > { %p1473_p12 = pnand %p1681_p9, %p1144_p11  ;;  %p1210_p13 = scmp.ne.s32.totalorder %s1676_s3, %s1209_s23 }
  0x18   : > { %p1216_p3 = scmp.lt.u32.totalorder %s1209_s23, %s1676_s3 }
  0x19   : > { %p1489_p0 = pneg %p1473_p12 }
  0x1b   : > { %p1212_p1 = pnand %p1489_p0, %p1210_p13 }
  0x1d   : > { %p1213_p2 = pneg %p1212_p1 }
  0x1f   : > { %p1218_p4 = pnand %p1216_p3, %p1213_p2 }
  0x21   : > { %1221 = shalt.err (!%p1218_p4)
}
  0x22   : > { %s1222_s19 = scalar_lea.vmem %s1469_s15, 2048  ;;  %p1230_p9 = scmp.lt.s32.totalorder %s1469_s15, %s1469_s15 }
  0x23   : > { %p1223_p7 = scmp.ne.s32.totalorder %s1469_s15, %s1222_s19  ;;  %p1231_p6 = scmp.lt.s32.totalorder %s1222_s19, %s1222_s19 }
  0x25   : > { %p1225_p8 = pnand %p1223_p7, %p1489_p0  ;;  %p1232_p13 = por %p1231_p6, %p1230_p9 }
  0x27   : > { %p1226_p11 = pneg %p1225_p8 }
  0x29   : > { %p1233_p1 = pnand %p1232_p13, %p1226_p11 }
  0x2b   : > { %1236 = shalt.err (!%p1233_p1)
}
  0x2c   : > { %s1368_s21 = smov 128   ;;  %s1369_s22 = smov 8  }
  0x2d   : > { %1150 = dma.hbm_to_vmem [thread:$0]  (!%p1473_p12), %s1676_s3, 2048, %s1469_s15, [#allocation6], %s1368_s21, %s1368_s21, %s1369_s22  }
  0x2e   : > { %s1237_s17 = scalar_lea.hbm %s1674_s1, 2048 }
  0x2f   : > { %p1238_p6 = scmp.ne.s32.totalorder %s1674_s1, %s1237_s17  ;;  %p1244_p3 = scmp.lt.u32.totalorder %s1237_s17, %s1674_s1 }
  0x31   : > { %p1240_p9 = pnand %p1238_p6, %p1489_p0 }
  0x33   : > { %p1241_p2 = pneg %p1240_p9 }
  0x35   : > { %p1246_p4 = pnand %p1244_p3, %p1241_p2 }
  0x37   : > { %1249 = shalt.err (!%p1246_p4)
}
  0x38   : > { %s1250_s15 = scalar_lea.vmem %s1477_s18, 2048  ;;  %p1258_p13 = scmp.lt.s32.totalorder %s1477_s18, %s1477_s18 }
  0x39   : > { %p1251_p7 = scmp.ne.s32.totalorder %s1477_s18, %s1250_s15  ;;  %p1259_p1 = scmp.lt.s32.totalorder %s1250_s15, %s1250_s15 }
  0x3b   : > { %p1253_p8 = pnand %p1251_p7, %p1489_p0  ;;  %p1260_p6 = por %p1259_p1, %p1258_p13 }
  0x3d   : > { %p1254_p11 = pneg %p1253_p8 }
  0x3f   : > { %p1261_p9 = pnand %p1260_p6, %p1254_p11 }
  0x41   : > { %1264 = shalt.err (!%p1261_p9)
}
  0x42   : > { %1147 = dma.hbm_to_vmem [thread:$0]  (!%p1473_p12), %s1674_s1, 2048, %s1477_s18, [#allocation3], %s1368_s21, %s1368_s21, %s1369_s22  }
  0x43   : > { %s1265_s29 = scalar_lea.hbm %s1678_s5, 2048 }
  0x44   : > { %p1266_p2 = scmp.ne.s32.totalorder %s1678_s5, %s1265_s29  ;;  %p1272_p7 = scmp.lt.u32.totalorder %s1265_s29, %s1678_s5 }
  0x46   : > { %p1268_p3 = pnand %p1266_p2, %p1489_p0 }
  0x48   : > { %p1269_p4 = pneg %p1268_p3 }
  0x4a   : > { %p1274_p8 = pnand %p1272_p7, %p1269_p4 }
  0x4c   : > { %1277 = shalt.err (!%p1274_p8)
}
  0x4d   : > { %s1278_s15 = scalar_lea.vmem %s250_s20, 2048  ;;  %p1286_p6 = scmp.lt.s32.totalorder %s250_s20, %s250_s20 }
  0x4e   : > { %p1279_p11 = scmp.ne.s32.totalorder %s250_s20, %s1278_s15  ;;  %p1287_p9 = scmp.lt.s32.totalorder %s1278_s15, %s1278_s15 }
  0x50   : > { %p1281_p13 = pnand %p1279_p11, %p1489_p0  ;;  %p1288_p5 = por %p1287_p9, %p1286_p6 }
  0x52   : > { %p1282_p1 = pneg %p1281_p13 }
  0x54   : > { %p1289_p10 = pnand %p1288_p5, %p1282_p1 }
  0x56   : > { %1292 = shalt.err (!%p1289_p10)
}
  0x57   : > { %1153 = dma.hbm_to_vmem [thread:$0]  (!%p1473_p12), %s1678_s5, 2048, %s250_s20, [#allocation6], %s1368_s21, %s1368_s21, %s1369_s22  }
  0x58   : > { %p1695_p2 = scmp.ne.s32.totalorder %s1692_s13, 0 }
  0x59   : > { %p1696_p0 = scmp.eq.s32.totalorder (!%p1695_p2), %s1435_s28, 0 }
  0x5a   : > { %275 = sbr.rel (%p1695_p2) target bundleno = 941 (0x3ad), region = 48 }
  0x61   : > { %1338 = dma.done.wait (%p1696_p0), [#allocation3], 2048   ;;  %p1697_p3 = pmov %p1696_p0 }
  0x62   : > { %p1698_p5 = pmov %p1696_p0 }
  0x63   : > { %1340 = vsyncadd (%p1697_p3), [#allocation3], 4294965248 }
  0x64   : > { %1342 = dma.done.wait (%p1698_p5), [#allocation6], 4096   ;;  %p1699_p10 = pmov %p1696_p0 }
  0x65   : > { %p314_p4 = scmp.lt.s32.totalorder %s1435_s28, 1  ;;  %v319_v0 = vlaneseq  ;;  %v1370_v1 = vmov 0.0|0.0   ;;  %v457_v8 = vld [vmem:[#allocation2] sm:$0xff]  ;;  %v458_v9 = vld [vmem:[#allocation2 + $0x8] sm:$0xff]  ;;  %v459_v13 = vld [vmem:[#allocation2 + $0x10] sm:$0xff]  ;;  %vm1371_vm0 = vmmov 0  }
  0x66   : > { %1344 = vsyncadd (%p1699_p10), [#allocation6], 4294963200  ;;  %1058 = vmatprep.subr.bf16.mxu0 %v1370_v1  ;;  %1082 = vmatprep.subr.bf16.mxu1 %v1370_v1  ;;  %v460_v14 = vld [vmem:[#allocation2 + $0x18] sm:$0xff]  ;;  %v1059_v18 = vpack.c.bf16 %v458_v9, %v457_v8  ;;  %v461_v20 = vld [vmem:[#allocation2 + $0x20] sm:$0xff]  ;;  %v1372_v34 = vmov 0.0   ;;  %vm481_vm7 = vcmask 1041409  }
  0x67   : > { %s315_s13 = scalar_select %p314_p4, %s1435_s28, 1  ;;  %v322_v2 = vshrl.u32 %v319_v0, 7  ;;  %v1062_v19 = vpack.c.bf16 %v460_v14, %v459_v13  ;;  %v462_v21 = vld [vmem:[#allocation2 + $0x28] sm:$0xff]  ;;  %v463_v27 = vld [vmem:[#allocation2 + $0x30] sm:$0xff]  ;;  %v464_v28 = vld [vmem:[#allocation2 + $0x38] sm:$0xff]  ;;  %985 = vmatprep.mubr.msk.f32.mxu0 %vm1371_vm0, %v1372_v34  ;;  %1020 = vmatprep.mubr.msk.f32.mxu1 %vm1371_vm0, %v1372_v34  ;;  %v320_v63 = vand.u32 127, %v319_v0 }
  0x68   : > { %1060 = vmatpush3.bf16.msra.mxu0 %v1059_v18  ;;  %v1065_v26 = vpack.c.bf16 %v462_v21, %v461_v20  ;;  %v1068_v31 = vpack.c.bf16 %v464_v28, %v463_v27  ;;  %v465_v32 = vld [vmem:[#allocation2 + $0x40] sm:$0xff]  ;;  %v466_v33 = vld [vmem:[#allocation2 + $0x48] sm:$0xff]  ;;  %v467_v36 = vld [vmem:[#allocation2 + $0x50] sm:$0xff]  ;;  %vm483_vm10 = vcmask 1042434   ;;  %vm485_vm11 = vcmask 1043459   ;;  %s311_s14 = sand.u32 1, %s1355_s25  }
  0x69   : > { %s885_s16 = sshll.u32 %s315_s13, 3  ;;  %v337_v3 = vsub.s32 2, %v322_v2  ;;  %v323_v4 = vsub.s32 0, %v322_v2  ;;  %v344_v5 = vsub.s32 3, %v322_v2  ;;  %v330_v6 = vsub.s32 1, %v322_v2  ;;  %1061 = vmatprep.subr.bf16.mxu0 %v1370_v1  ;;  %v468_v37 = vld [vmem:[#allocation2 + $0x58] sm:$0xff] }
  0x6a   : > { %s317_s21 = scalar_lea.vmem %s1673_s0, %s885_s16  ;;  %v358_v12 = vsub.s32 5, %v322_v2  ;;  %v351_v17 = vsub.s32 4, %v322_v2  ;;  %v372_v24 = vsub.s32 7, %v322_v2  ;;  %v365_v25 = vsub.s32 6, %v322_v2  ;;  %v576_v38 = vld [vmem:[#allocation5] sm:$0xff]  ;;  %v577_v39 = vld [vmem:[#allocation5 + $0x8] sm:$0xff] }
  0x6b   : > { %v318_v7 = vld [vmem:[%s317_s21] sm:$0xff]  ;;  %v1071_v35 = vpack.c.bf16 %v466_v33, %v465_v32  ;;  %v578_v40 = vld [vmem:[#allocation5 + $0x10] sm:$0xff]  ;;  %v1083_v41 = vpack.c.bf16 %v577_v39, %v576_v38  ;;  %v579_v42 = vld [vmem:[#allocation5 + $0x18] sm:$0xff]  ;;  %v1074_v43 = vpack.c.bf16 %v468_v37, %v467_v36  ;;  %vm487_vm12 = vcmask 1044484   ;;  %s884_s17 = sshll.u32 %s311_s14, 3  ;;  %s899_s19 = sshll.u32 %s1435_s28, 7 }
  0x6c   : > { %v338_v10 = vrot.slane %v318_v7, %v337_v3  ;;  %v324_v11 = vrot.slane %v318_v7, %v323_v4  ;;  %v345_v15 = vrot.slane %v318_v7, %v344_v5  ;;  %v331_v16 = vrot.slane %v318_v7, %v330_v6  ;;  %1063 = vmatpush3.bf16.msra.mxu0 %v1062_v19  ;;  %v469_v44 = vld [vmem:[#allocation2 + $0x60] sm:$0xff]  ;;  %v470_v45 = vld [vmem:[#allocation2 + $0x68] sm:$0xff]  ;;  %v471_v50 = vld [vmem:[#allocation2 + $0x70] sm:$0xff]  ;;  %s313_s15 = scalar_lea.vmem [#allocation8], %s884_s17  ;;  %s1631_s16 = scalar_lea.hbm %s1680_s7, %s899_s19 }
  0x6d   : > { %v359_v22 = vrot.slane %v318_v7, %v358_v12  ;;  %v352_v23 = vrot.slane %v318_v7, %v351_v17  ;;  %1064 = vmatprep.subr.bf16.mxu0 %v1370_v1  ;;  %v373_v29 = vrot.slane %v318_v7, %v372_v24  ;;  %v366_v30 = vrot.slane %v318_v7, %v365_v25  ;;  %v580_v47 = vld [vmem:[#allocation5 + $0x20] sm:$0xff]  ;;  %v581_v48 = vld [vmem:[#allocation5 + $0x28] sm:$0xff]  ;;  %v472_v51 = vld [vmem:[#allocation2 + $0x78] sm:$0xff]  ;;  %s784_s18 = sshll.u32 %s313_s15, 4  ;;  %s771_s20 = scalar_lea.sflag [#allocation4], %s311_s14  ;;  %s1633_s18 = int_to_ptr.vmem [resolvable:$true] %s784_s18 }
  0x6e   : > { %340 = vbcast.lane.b32.xlu1 %v338_v10, 256  ;;  %326 = vbcast.lane.b32.xlu0 %v324_v11, 256  ;;  %v1086_v46 = vpack.c.bf16 %v579_v42, %v578_v40  ;;  %v1077_v49 = vpack.c.bf16 %v470_v45, %v469_v44  ;;  %v1089_v52 = vpack.c.bf16 %v581_v48, %v580_v47  ;;  %v582_v53 = vld [vmem:[#allocation5 + $0x30] sm:$0xff]  ;;  %v583_v54 = vld [vmem:[#allocation5 + $0x38] sm:$0xff]  ;;  %v584_v57 = vld [vmem:[#allocation5 + $0x40] sm:$0xff]  ;;  %vm489_vm13 = vcmask 1045509  }
  0x6f   : > { %1084 = vmatpush3.bf16.msra.mxu1 %v1083_v41  ;;  %v1080_v55 = vpack.c.bf16 %v472_v51, %v471_v50  ;;  %v1092_v56 = vpack.c.bf16 %v583_v54, %v582_v53  ;;  %v585_v58 = vld [vmem:[#allocation5 + $0x48] sm:$0xff]  ;;  %v586_v60 = vld [vmem:[#allocation5 + $0x50] sm:$0xff]  ;;  %v587_v61 = vld [vmem:[#allocation5 + $0x58] sm:$0xff]  ;;  %vm491_vm14 = vcmask 1046534   ;;  %vm493_vm15 = vcmask 1047559   ;;  %s1293_s9 = scalar_lea.vmem %s1633_s18, 128 }
  0x70   : > { %1066 = vmatpush3.bf16.msra.mxu0 %v1065_v26  ;;  %1085 = vmatprep.subr.bf16.mxu1 %v1370_v1  ;;  %v1095_v59 = vpack.c.bf16 %v585_v58, %v584_v57  ;;  %v1098_v62 = vpack.c.bf16 %v587_v61, %v586_v60  ;;  %p1294_p12 = scmp.ne.s32.totalorder %s1633_s18, %s1293_s9  ;;  %p1700_p7 = scmp.ne.s32.totalorder %s1690_s11, 0 }
  0x71   : > { %1067 = vmatprep.subr.bf16.mxu0 %v1370_v1  ;;  %s1373_s28 = smov [#allocation8]  }
  0x72   : > { %347 = vbcast.lane.b32.xlu1 %v345_v15, 256  ;;  %333 = vbcast.lane.b32.xlu0 %v331_v16, 256  ;;  %p1295_p8 = pnand %p1294_p12, %p1700_p7  ;;  %s1297_s21 = sshll.u32 %s1373_s28, 4  ;;  %s1298_s21 = int_to_ptr.vmem [resolvable:$false] %s1297_s21 }
  0x73   : > { %1087 = vmatpush3.bf16.msra.mxu1 %v1086_v46  ;;  %s1299_s22 = scalar_lea.vmem %s1298_s21, 256  ;;  %p1300_p13 = scmp.lt.s32.totalorder %s1633_s18, %s1298_s21 }
  0x74   : > { %1069 = vmatpush3.bf16.msra.mxu0 %v1068_v31  ;;  %1088 = vmatprep.subr.bf16.mxu1 %v1370_v1  ;;  %p1296_p11 = pneg %p1295_p8  ;;  %p1301_p1 = scmp.lt.s32.totalorder %s1299_s22, %s1293_s9 }
  0x75   : > { %1070 = vmatprep.subr.bf16.mxu0 %v1370_v1 }
  0x76   : > { %361 = vbcast.lane.b32.xlu1 %v359_v22, 256  ;;  %354 = vbcast.lane.b32.xlu0 %v352_v23, 256  ;;  %p1302_p6 = por %p1301_p1, %p1300_p13 }
  0x77   : > { %1090 = vmatpush3.bf16.msra.mxu1 %v1089_v52 }
  0x78   : > { %1072 = vmatpush3.bf16.msra.mxu0 %v1071_v35  ;;  %1091 = vmatprep.subr.bf16.mxu1 %v1370_v1  ;;  %p1303_p9 = pnand %p1302_p6, %p1296_p11 }
  0x79   : > { %1073 = vmatprep.subr.bf16.mxu0 %v1370_v1 }
  0x7a   : > { %375 = vbcast.lane.b32.xlu1 %v373_v29, 256  ;;  %368 = vbcast.lane.b32.xlu0 %v366_v30, 256 }
  0x7b   : > { %1093 = vmatpush3.bf16.msra.mxu1 %v1092_v56 }
  0x7c   : > { %1075 = vmatpush3.bf16.msra.mxu0 %v1074_v43  ;;  %1094 = vmatprep.subr.bf16.mxu1 %v1370_v1 }
  0x7d   : > { %1076 = vmatprep.subr.bf16.mxu0 %v1370_v1 }
  0x7f   : > { %1096 = vmatpush3.bf16.msra.mxu1 %v1095_v59 }
  0x80   : > { %1078 = vmatpush3.bf16.msra.mxu0 %v1077_v49  ;;  %1097 = vmatprep.subr.bf16.mxu1 %v1370_v1 }
  0x81   : > { %1079 = vmatprep.subr.bf16.mxu0 %v1370_v1 }
  0x83   : > { %1099 = vmatpush3.bf16.msra.mxu1 %v1098_v62 }
  0x84   : > { %1081 = vmatpush3.bf16.msra.mxu0 %v1080_v55  ;;  %1100 = vmatprep.subr.bf16.mxu1 %v1370_v1 }
  0x85   : > { %1106 = vmatprep.subr.bf16.mxu0 %v1370_v1 }
  0xe0   : > { %v341_v2 = vpop.permute.xlu1 %340  ;;  %v327_v3 = vpop.permute.xlu0 %326 }
  0xe1   : > { %vm379_vm1 = vcmp.eq.s32.totalorder %v341_v2, %v320_v63  ;;  %vm377_vm2 = vcmp.eq.s32.totalorder %v327_v3, %v320_v63 }
  0xe2   : > { %v888_v4 = vsel %vm379_vm1, 1.0, %v1372_v34  ;;  %v886_v5 = vsel %vm377_vm2, 1.0, %v1372_v34 }
  0xe3   : > { %v413_v6 = vrot.slane %v888_v4, 4  ;;  %v401_v7 = vrot.slane %v886_v5, 4 }
  0xe4   : > { %v348_v8 = vpop.permute.xlu1 %347  ;;  %v334_v9 = vpop.permute.xlu0 %333 }
  0xe5   : > { %v414_v10 = vadd.f32 %v888_v4, %v413_v6  ;;  %v402_v11 = vadd.f32 %v886_v5, %v401_v7  ;;  %vm380_vm3 = vcmp.eq.s32.totalorder %v348_v8, %v320_v63  ;;  %vm378_vm4 = vcmp.eq.s32.totalorder %v334_v9, %v320_v63 }
  0xe6   : > { %v889_v12 = vsel %vm380_vm3, 1.0, %v1372_v34  ;;  %v887_v0 = vsel %vm378_vm4, 1.0, %v1372_v34 }
  0xe7   : > { %v415_v13 = vrot.slane %v414_v10, 2  ;;  %v403_v14 = vrot.slane %v402_v11, 2  ;;  %v419_v15 = vrot.slane %v889_v12, 4  ;;  %v407_v16 = vrot.slane %v887_v0, 4 }
  0xe8   : > { %v362_v17 = vpop.permute.xlu1 %361  ;;  %v355_v18 = vpop.permute.xlu0 %354 }
  0xe9   : > { %v404_v19 = vadd.f32 %v403_v14, %v402_v11  ;;  %v420_v20 = vadd.f32 %v889_v12, %v419_v15  ;;  %v408_v21 = vadd.f32 %v887_v0, %v407_v16  ;;  %vm382_vm5 = vcmp.eq.s32.totalorder %v362_v17, %v320_v63  ;;  %v588_v11 = vld [vmem:[#allocation5 + $0x60] sm:$0xff]  ;;  %v589_v12 = vld [vmem:[#allocation5 + $0x68] sm:$0xff]  ;;  %v591_v14 = vld [vmem:[#allocation5 + $0x78] sm:$0xff] }
  0xea   : > { %vm381_vm6 = vcmp.eq.s32.totalorder %v355_v18, %v320_v63  ;;  %v416_v22 = vadd.f32 %v415_v13, %v414_v10  ;;  %v891_v25 = vsel %vm382_vm5, 1.0, %v1372_v34  ;;  %v1101_v0 = vpack.c.bf16 %v589_v12, %v588_v11  ;;  %v590_v13 = vld [vmem:[#allocation5 + $0x70] sm:$0xff]  ;;  %v670_v16 = vld [vmem:[#allocation7] sm:$0xff]  ;;  %v671_v17 = vld [vmem:[#allocation7 + $0x8] sm:$0xff] }
  0xeb   : > { %v421_v23 = vrot.slane %v420_v20, 2  ;;  %v409_v24 = vrot.slane %v408_v21, 2  ;;  %v890_v26 = vsel %vm381_vm6, 1.0, %v1372_v34  ;;  %v405_v29 = vrot.slane %v404_v19, 1  ;;  %v672_v18 = vld [vmem:[#allocation7 + $0x10] sm:$0xff] }
  0xec   : > { %v376_v27 = vpop.permute.xlu1 %375  ;;  %v369_v28 = vpop.permute.xlu0 %368  ;;  %v431_v32 = vrot.slane %v891_v25, 4  ;;  %v425_v33 = vrot.slane %v890_v26, 4  ;;  %v417_v35 = vrot.slane %v416_v22, 1  ;;  %1102 = vmatpush3.bf16.msra.mxu1 %v1101_v0  ;;  %v1104_v15 = vpack.c.bf16 %v591_v14, %v590_v13 }
  0xed   : > { %v422_v30 = vadd.f32 %v421_v23, %v420_v20  ;;  %v410_v31 = vadd.f32 %v409_v24, %v408_v21  ;;  %vm384_vm8 = vcmp.eq.s32.totalorder %v376_v27, %v320_v63  ;;  %vm383_vm9 = vcmp.eq.s32.totalorder %v369_v28, %v320_v63  ;;  %1103 = vmatprep.subr.bf16.mxu1 %v1370_v1  ;;  %v673_v20 = vld [vmem:[#allocation7 + $0x18] sm:$0xff]  ;;  %v676_v24 = vld [vmem:[#allocation7 + $0x30] sm:$0xff]  ;;  %v678_v27 = vld [vmem:[#allocation7 + $0x40] sm:$0xff] }
  0xee   : > { %v893_v37 = vsel %vm384_vm8, 1.0, %v1372_v34  ;;  %v892_v38 = vsel %vm383_vm9, 1.0, %v1372_v34  ;;  %v432_v39 = vadd.f32 %v891_v25, %v431_v32  ;;  %v426_v40 = vadd.f32 %v890_v26, %v425_v33  ;;  %v677_v25 = vld [vmem:[#allocation7 + $0x38] sm:$0xff]  ;;  %v679_v28 = vld [vmem:[#allocation7 + $0x48] sm:$0xff]  ;;  %v682_v33 = vld [vmem:[#allocation7 + $0x60] sm:$0xff] }
  0xef   : > { %v411_v36 = vrot.slane %v410_v31, 1  ;;  %v443_v41 = vrot.slane %v893_v37, 4  ;;  %v437_v42 = vrot.slane %v892_v38, 4  ;;  %v406_v43 = vadd.f32 %v405_v29, %v404_v19 }
  0xf0   : > { %v423_v44 = vrot.slane %v422_v30, 1  ;;  %v433_v46 = vrot.slane %v432_v39, 2  ;;  %v427_v47 = vrot.slane %v426_v40, 2  ;;  %v418_v50 = vadd.f32 %v417_v35, %v416_v22  ;;  %1105 = vmatpush3.bf16.msra.mxu1 %v1104_v15  ;;  %v675_v22 = vld [vmem:[#allocation7 + $0x28] sm:$0xff] }
  0xf1   : > { %v412_v45 = vadd.f32 %v411_v36, %v410_v31  ;;  %v444_v48 = vadd.f32 %v893_v37, %v443_v41  ;;  %v438_v49 = vadd.f32 %v892_v38, %v437_v42  ;;  %v1107_v19 = vpack.c.bf16 %v671_v17, %v670_v16  ;;  %v681_v31 = vld [vmem:[#allocation7 + $0x58] sm:$0xff]  ;;  %v683_v35 = vld [vmem:[#allocation7 + $0x68] sm:$0xff]  ;;  %v894_v38 = vld [vmem:[%s1675_s2] ss:$0 sm:$0xff] }
  0xf2   : > { %v434_v52 = vadd.f32 %v433_v46, %v432_v39  ;;  %v428_v53 = vadd.f32 %v427_v47, %v426_v40  ;;  %v424_v56 = vadd.f32 %v423_v44, %v422_v30  ;;  %v1110_v21 = vpack.c.bf16 %v673_v20, %v672_v18  ;;  %v680_v30 = vld [vmem:[#allocation7 + $0x50] sm:$0xff]  ;;  %v685_v44 = vld [vmem:[#allocation7 + $0x78] sm:$0xff]  ;;  %v895_v46 = vld [vmem:[%s1677_s4] ss:$0 sm:$0xff] }
  0xf3   : > { %v482_v51 = vsel %vm481_vm7, %v412_v45, %v406_v43  ;;  %v445_v54 = vrot.slane %v444_v48, 2  ;;  %v439_v55 = vrot.slane %v438_v49, 2  ;;  %v1116_v26 = vpack.c.bf16 %v677_v25, %v676_v24  ;;  %v684_v43 = vld [vmem:[#allocation7 + $0x70] sm:$0xff] }
  0xf4   : > { %v484_v57 = vsel %vm483_vm10, %v418_v50, %v482_v51  ;;  %v435_v58 = vrot.slane %v434_v52, 1  ;;  %v429_v59 = vrot.slane %v428_v53, 1  ;;  %v1119_v29 = vpack.c.bf16 %v679_v28, %v678_v27  ;;  %v896_v50 = vld [vmem:[%s1679_s6] ss:$0 sm:$0xff] }
  0xf5   : > { %v446_v60 = vadd.f32 %v445_v54, %v444_v48  ;;  %v440_v61 = vadd.f32 %v439_v55, %v438_v49  ;;  %v486_v62 = vsel %vm485_vm11, %v424_v56, %v484_v57  ;;  %v1122_v32 = vpack.c.bf16 %v681_v31, %v680_v30 }
  0xf6   : > { %v436_v63 = vadd.f32 %v435_v58, %v434_v52  ;;  %v430_v2 = vadd.f32 %v429_v59, %v428_v53  ;;  %v1125_v36 = vpack.c.bf16 %v683_v35, %v682_v33  ;;  %v1128_v45 = vpack.c.bf16 %v685_v44, %v684_v43 }
  0xf7   : > { %v447_v3 = vrot.slane %v446_v60, 1  ;;  %v441_v4 = vrot.slane %v440_v61, 1 }
  0xf8   : > { %v488_v7 = vsel %vm487_vm12, %v430_v2, %v486_v62 }
  0xf9   : > { %v442_v5 = vadd.f32 %v441_v4, %v440_v61  ;;  %v448_v6 = vadd.f32 %v447_v3, %v446_v60  ;;  %v490_v8 = vsel %vm489_vm13, %v436_v63, %v488_v7 }
  0xfb   : > { %v492_v9 = vsel %vm491_vm14, %v442_v5, %v490_v8 }
  0xfc   : > { %v494_v10 = vsel %vm493_vm15, %v448_v6, %v492_v9 }
  0xfd   : > { %986 = vmatmul.mubr.f32.vlgmr.msra.gmra.mrb[0].mxu0 %v494_v10 }
  0xfe   : > { %1055 = vmatprep.mubr.msk.f32.mxu0 %vm1371_vm0, %v1372_v34  ;;  %1108 = vmatpush3.bf16.msra.mxu0 %v1107_v19  ;;  %v674_v34 = vld [vmem:[#allocation7 + $0x20] sm:$0xff] }
  0xff   : > { %1109 = vmatprep.subr.bf16.mxu0 %v1370_v1  ;;  %v1113_v23 = vpack.c.bf16 %v675_v22, %v674_v34 }
 0x102   : > { %1111 = vmatpush3.bf16.msra.mxu0 %v1110_v21 }
 0x103   : > { %1112 = vmatprep.subr.bf16.mxu0 %v1370_v1 }
 0x106   : > { %1114 = vmatpush3.bf16.msra.mxu0 %v1113_v23 }
 0x107   : > { %1115 = vmatprep.subr.bf16.mxu0 %v1370_v1 }
 0x10a   : > { %1117 = vmatpush3.bf16.msra.mxu0 %v1116_v26 }
 0x10b   : > { %1118 = vmatprep.subr.bf16.mxu0 %v1370_v1 }
 0x10e   : > { %1120 = vmatpush3.bf16.msra.mxu0 %v1119_v29 }
 0x10f   : > { %1121 = vmatprep.subr.bf16.mxu0 %v1370_v1 }
 0x112   : > { %1123 = vmatpush3.bf16.msra.mxu0 %v1122_v32 }
 0x113   : > { %1124 = vmatprep.subr.bf16.mxu0 %v1370_v1 }
 0x116   : > { %1126 = vmatpush3.bf16.msra.mxu0 %v1125_v36 }
 0x117   : > { %1127 = vmatprep.subr.bf16.mxu0 %v1370_v1 }
 0x11a   : > { %1129 = vmatpush3.bf16.msra.mxu0 %v1128_v45 }
 0x1d0   : > { %v562_v37 = vpop.f32.mrb[0].mxu0 }
 0x1d1   : > { %v566_v39 = vmul.f32 0.125, %v562_v37  ;;  %v987_v40 = vpop.f32.mrb[1].mxu0 }
 0x1d3   : > { %v574_v41 = vadd.f32 %v894_v38, %v566_v39 }
 0x1d5   : > { %v575_v42 = vmax.f32 %v574_v41, 0.0 }
 0x1d7   : > { %1021 = vmatmul.mubr.f32.vlgmr.msra.gmra.mrb[0].mxu1 %v575_v42 }
 0x2aa   : > { %v665_v1 = vpop.f32.mrb[0].mxu1 }
 0x2ab   : > { %v666_v47 = vadd.f32 %v895_v46, %v665_v1  ;;  %v1022_v48 = vpop.f32.mrb[1].mxu1 }
 0x2ad   : > { %v669_v49 = vmax.f32 %v666_v47, 0.0 }
 0x2af   : > { %1056 = vmatmul.mubr.f32.vlgmr.msra.gmra.mrb[2].mxu0 %v669_v49 }
 0x382   : > { %v759_v51 = vpop.f32.mrb[2].mxu0 }
 0x383   : > { %v760_v52 = vadd.f32 %v896_v50, %v759_v51  ;;  %v1057_v53 = vpop.f32.mrb[3].mxu0 }
 0x385   : > { %v897_v54 = vmul.f32 -1.442695, %v760_v52 }
 0x387   : > { %1205 = vpow2.f32 %v897_v54 }
 0x391   : > { %v1206_v55 = vpop.eup %1205 }
 0x392   : > { %v766_v56 = vadd.f32 1.0, %v1206_v55 }
 0x394   : > { %1207 = vrcp.f32 %v766_v56 }
 0x39e   : > { %v1208_v57 = vpop.eup %1207 }
 0x39f   : > { %769 = vst [vmem:[%s313_s15] sm:$0xff] %v1208_v57 }
 0x3a0   : > { %1306 = shalt.err (!%p1303_p9)
}
 0x3a1   : > { %s1307_s30 = scalar_lea.hbm %s1631_s16, 128  ;;  %s1311_s29 = scalar_lea.hbm %s1680_s7, 256 }
 0x3a2   : > { %p1308_p2 = scmp.ne.s32.totalorder %s1631_s16, %s1307_s30  ;;  %p1312_p5 = scmp.lt.u32.totalorder %s1631_s16, %s1680_s7 }
 0x3a3   : > { %p1313_p10 = scmp.lt.u32.totalorder %s1311_s29, %s1307_s30  ;;  %p1315_p12 = scmp.lt.u32.totalorder %s1307_s30, %s1631_s16 }
 0x3a4   : > { %p1309_p0 = pnand %p1308_p2, %p1700_p7 }
 0x3a5   : > { %p1314_p4 = por %p1313_p10, %p1312_p5 }
 0x3a6   : > { %p1310_p3 = pneg %p1309_p0 }
 0x3a7   : > { %p1316_p8 = por %p1315_p12, %p1314_p4 }
 0x3a9   : > { %p1317_p11 = pnand %p1316_p8, %p1310_p3 }
 0x3ab   : > { %1320 = shalt.err (!%p1317_p11)
}
 0x3ac   : > { %1142 = dma.vmem_to_hbm [thread:$0]  (%p1700_p7), %s1633_s18, 128, %s1631_s16, %s771_s20  }
 0x3ad PF: > { %p1164_p13 = scmp.ge.s32.totalorder %s1363_s27, 2  ;;  %s796_s17 = sand.u32 1, %s1351_s24  }
 0x3ae   : > { %p1701_p1 = scmp.ne.s32.totalorder %s1691_s12, 0  ;;  %s797_s19 = scalar_lea.sflag [#allocation4], %s796_s17 }
 0x3b0   : > { %p1155_p6 = pnand %p1164_p13, %p1701_p1 }
 0x3b2   : > { %1346 = dma.done.wait (!%p1155_p6), %s797_s19, 128  }
 0x3b3   : > { %1348 = vsyncadd (!%p1155_p6), %s797_s19, 4294967168  ;;  %s1702_s27 = sld [smem:[#allocation13_spill]]  ;;  %s1703_s15 = sld [smem:[#allocation12_spill]] }
 0x3b4   : > { %s1704_s26 = sld [smem:[#allocation14_spill]]  ;;  %s1705_s24 = smov %s1355_s25 }
 0x3b9   : > { %p19_p9 = scmp.ge.s32.totalorder %s1702_s27, 4   ;;  %s1706_s25 = smov %s1703_s15 }
 0x3bb   :  { %21 = sbr.rel (!%p19_p9) target bundleno = 5 (0x5), region = 96 }
 0x3c2   :  { %802 = vsyncpa [#allocation3], 1 }
 0x3c3   :  { %804 = vsyncpa [#allocation3 + $0x1], 1 }
 0x3c4   :  { %805 = vsyncpa [#allocation6], 1 }
 0x3c5   :  { %806 = vsyncpa [#allocation4], 1 }
 0x3c6   :  { %808 = vsyncpa [#allocation4 + $0x1], 1 }

</bundles_post_ra>
